<compile_context>
chip_gen: v7x
topology: tpu7x:2x2x1
jax: 0.10.0
libtpu: 0.0.40
codegen_flags: <defaults>
</compile_context>

<pallas_src>
import functools
import math

import jax
import jax.numpy as jnp
from jax import lax
from jax.experimental import pallas as pl
from jax.experimental.pallas import tpu as pltpu

BN_EPS = 1e-5


# ---------------------------------------------------------------------------
# Kernel-side helpers. All activations use the lane-dense (N*H, W*C) layout.
# ---------------------------------------------------------------------------

def _allreduce_over_w(a, c, w):
    """Sum a (rows, W*C) array over the W positions of each channel packed in
    the lanes, broadcasting the per-channel sum back to every W position.
    Pure XLU (roll) + VPU (add), f32-exact."""
    if w & (w - 1) == 0:                       # power-of-two W: doubling tree
        shift = c
        while shift < c * w:
            a = a + pltpu.roll(a, shift=shift, axis=1)
            shift *= 2
        return a
    # General W: accumulate W-1 rolled copies of the original (small W only).
    acc = a
    for j in range(1, w):
        acc = acc + pltpu.roll(a, shift=j * c, axis=1)
    return acc


def _batchnorm(y, img_w, gamma_t, beta_t, inv_cnt):
    """Training-mode BatchNorm2d on the (N*H, W*C) layout, stats in f32."""
    c = y.shape[1] // img_w
    s = _allreduce_over_w(jnp.sum(y, axis=0, keepdims=True), c, img_w)
    ss = _allreduce_over_w(jnp.sum(y * y, axis=0, keepdims=True), c, img_w)
    mean = s * inv_cnt
    var = ss * inv_cnt - mean * mean           # biased variance (training fwd)
    scale = gamma_t * lax.rsqrt(var + BN_EPS)  # one rsqrt per BN (EUP)
    return y * scale + (beta_t - mean * scale)


def _group_kernel(identities, img_h, img_w, x_ref, *rest):
    """All blocks of the group, fused. `identities` is static per-block info."""
    out_ref = rest[-1]
    prm = rest[:-1]

    h = x_ref[...]                             # (N*H, W*Cin0) f32
    nh = h.shape[0]
    inv_cnt = 1.0 / float(nh * img_w)          # 1 / (N*H*W)

    # Image-boundary row masks; pre-broadcast to full lane width once per
    # distinct activation width (JAX does not CSE broadcast_in_dim).
    row = lax.broadcasted_iota(jnp.int32, (nh, 1), 0)
    top_col = (row % img_h) == 0
    bot_col = (row % img_h) == (img_h - 1)
    mask_cache = {}

    def masks(width):
        if width not in mask_cache:
            mask_cache[width] = (jnp.broadcast_to(top_col, (nh, width)),
                                 jnp.broadcast_to(bot_col, (nh, width)))
        return mask_cache[width]

    def conv3x3(x_f32, x_bf, m_ref):
        """3x3 'same' conv as three accumulating MXU matmuls (up/mid/down)."""
        top_m, bot_m = masks(x_f32.shape[1])
        up = jnp.where(top_m, 0.0, pltpu.roll(x_f32, shift=1, axis=0))
        down = jnp.where(bot_m, 0.0, pltpu.roll(x_f32, shift=nh - 1, axis=0))
        acc = jnp.dot(x_bf, m_ref[1], preferred_element_type=jnp.float32)
        acc = acc + jnp.dot(up.astype(jnp.bfloat16), m_ref[0],
                            preferred_element_type=jnp.float32)
        acc = acc + jnp.dot(down.astype(jnp.bfloat16), m_ref[2],
                            preferred_element_type=jnp.float32)
        return acc

    i = 0
    for identity in identities:
        m1, g1, b1, m2, g2, b2 = (prm[i + k] for k in range(6))
        i += 6
        if not identity:
            ws, gs, bs = (prm[i + k] for k in range(3))
            i += 3

        h_bf = h.astype(jnp.bfloat16)          # reused: conv1 mid tap + skip

        # conv3x3 -> BN -> ReLU
        y = conv3x3(h, h_bf, m1)
        y = jnp.maximum(_batchnorm(y, img_w, g1[...], b1[...], inv_cnt), 0.0)
        # conv3x3 -> BN
        y_bf = y.astype(jnp.bfloat16)
        y = _batchnorm(conv3x3(y, y_bf, m2), img_w, g2[...], b2[...], inv_cnt)

        # Skip path (identity, or block-diagonal 1x1-conv matmul + BN).
        if identity:
            skip = h
        else:
            skip = jnp.dot(h_bf, ws[...], preferred_element_type=jnp.float32)
            skip = _batchnorm(skip, img_w, gs[...], bs[...], inv_cnt)

        h = jnp.maximum(y + skip, 0.0)

    out_ref[...] = h


# ---------------------------------------------------------------------------
# Wrapper-side weight repacking (runs once in XLA; constant-folded under jit).
# ---------------------------------------------------------------------------

def _banded_conv3x3_weight(k_hwio, w):
    """(3,3,Cin,Cout) HWIO kernel -> (3, W*Cin, W*Cout) banded matmul weights.

    Slice dy pairs with the vertical neighbour x[r+dy-1]; inside a slice,
    entry [jin*Cin+ci, jout*Cout+co] = k[dy, jin-jout+1, ci, co] (0 outside the
    horizontal band), i.e. the 1-D conv along W is folded into the matmul.
    """
    cin, cout = k_hwio.shape[2], k_hwio.shape[3]
    jin = jnp.arange(w)[:, None]
    jout = jnp.arange(w)[None, :]
    dx = jin - jout + 1                                    # (W, W)
    valid = (dx >= 0) & (dx <= 2)
    dxc = jnp.clip(dx, 0, 2)
    blocks = []
    for dy in range(3):
        g = k_hwio[dy][dxc]                                # (W, W, Cin, Cout)
        g = jnp.where(valid[:, :, None, None], g, 0.0)
        blocks.append(jnp.transpose(g, (0, 2, 1, 3)).reshape(w * cin, w * cout))
    return jnp.stack(blocks, axis=0)                       # (3, W*Cin, W*Cout)


def _block_diag_1x1_weight(ws, w):
    """(Cin,Cout) 1x1-conv weight -> block-diagonal (W*Cin, W*Cout)."""
    return jnp.kron(jnp.eye(w, dtype=ws.dtype), ws)


def _tiled_channel_param(v, w):
    """(C,) per-channel BN param -> (1, W*C), matching the lane layout."""
    return jnp.tile(v, w).reshape(1, w * v.shape[0]).astype(jnp.float32)


def group_of_blocks_forward(x_nchw, group_params):
    """GroupOfBlocks.forward; input/output are NCHW like PyTorch."""
    n, cin0, img_h, img_w = x_nchw.shape
    cout = group_params[0][0]["w1"].shape[-1]
    identities = tuple(ident for _, ident in group_params)

    # Pad the first block's input channels with zeros so the activation's lane
    # width (W*Cin) is a multiple of 128 (full-lane vregs, aligned operands).
    # Zero rows are added to the matching weights, so semantics are unchanged.
    # An identity-skip first block is never padded (the skip reads h directly).
    lane_step = 128 // math.gcd(img_w, 128)
    if (not identities[0]) and (img_w * cin0) % 128 != 0:
        cpad0 = ((cin0 + lane_step - 1) // lane_step) * lane_step
    else:
        cpad0 = cin0

    # NCHW -> lane-dense (N*H, W*Cin), with optional channel padding.
    x_nhwc = jnp.transpose(x_nchw, (0, 2, 3, 1))
    if cpad0 != cin0:
        x_nhwc = jnp.pad(x_nhwc, ((0, 0), (0, 0), (0, 0), (0, cpad0 - cin0)))
    xf = x_nhwc.reshape(n * img_h, img_w * cpad0)

    inputs = [xf]
    nh = n * img_h
    wc = img_w * cout
    flops = 0
    transc = 0
    for bi, (prm, ident) in enumerate(group_params):
        w1 = prm["w1"]
        ws = prm.get("ws")
        if bi == 0 and cpad0 != cin0:
            w1 = jnp.pad(w1, ((0, 0), (0, 0), (0, cpad0 - cin0), (0, 0)))
            if not ident:
                ws = jnp.pad(ws, ((0, cpad0 - cin0), (0, 0)))
        inputs += [
            _banded_conv3x3_weight(w1, img_w).astype(jnp.bfloat16),
            _tiled_channel_param(prm["g1"], img_w),
            _tiled_channel_param(prm["b1"], img_w),
            _banded_conv3x3_weight(prm["w2"], img_w).astype(jnp.bfloat16),
            _tiled_channel_param(prm["g2"], img_w),
            _tiled_channel_param(prm["b2"], img_w),
        ]
        if not ident:
            inputs += [
                _block_diag_1x1_weight(ws, img_w).astype(jnp.bfloat16),
                _tiled_channel_param(prm["gs"], img_w),
                _tiled_channel_param(prm["bs"], img_w),
            ]
        cin_lanes = img_w * (cpad0 if bi == 0 else cout)
        flops += 3 * 2 * nh * cin_lanes * wc          # conv1: 3 taps
        flops += 3 * 2 * nh * wc * wc                 # conv2: 3 taps
        transc += 2 * wc                              # 2 BN rsqrts
        if not ident:
            flops += 2 * nh * cin_lanes * wc          # 1x1 skip matmul
            transc += wc

    out_bytes = nh * wc * 4
    bytes_accessed = out_bytes + int(
        sum(int(v.size) * jnp.dtype(v.dtype).itemsize for v in inputs))

    kernel = functools.partial(_group_kernel, identities, img_h, img_w)
    vmem = pl.BlockSpec(memory_space=pltpu.MemorySpace.VMEM)
    out_f = pl.pallas_call(
        kernel,
        out_shape=jax.ShapeDtypeStruct((nh, wc), jnp.float32),
        in_specs=[vmem] * len(inputs),
        out_specs=vmem,
        cost_estimate=pl.CostEstimate(flops=int(flops),
                                      transcendentals=int(transc),
                                      bytes_accessed=int(bytes_accessed)),
        compiler_params=pltpu.CompilerParams(vmem_limit_bytes=32 * 1024 * 1024),
    )(*inputs)

    return jnp.transpose(out_f.reshape(n, img_h, img_w, cout), (0, 3, 1, 2))


# ---------------------------------------------------------------------------
# Parameter init (random weights; BN affine slightly randomized so the check
# is meaningful — forward semantics do not depend on the init values).
# ---------------------------------------------------------------------------

def init_block_params(key, cin, cout):
    ks = jax.random.split(key, 9)
    return {
        "w1": jax.random.normal(ks[0], (3, 3, cin, cout), jnp.float32) / jnp.sqrt(9.0 * cin),
        "w2": jax.random.normal(ks[1], (3, 3, cout, cout), jnp.float32) / jnp.sqrt(9.0 * cout),
        "g1": 1.0 + 0.1 * jax.random.normal(ks[2], (cout,), jnp.float32),
        "b1": 0.1 * jax.random.normal(ks[3], (cout,), jnp.float32),
        "g2": 1.0 + 0.1 * jax.random.normal(ks[4], (cout,), jnp.float32),
        "b2": 0.1 * jax.random.normal(ks[5], (cout,), jnp.float32),
        "ws": jax.random.normal(ks[6], (cin, cout), jnp.float32) / jnp.sqrt(float(cin)),
        "gs": 1.0 + 0.1 * jax.random.normal(ks[7], (cout,), jnp.float32),
        "bs": 0.1 * jax.random.normal(ks[8], (cout,), jnp.float32),
    }


def init_group_params(key, in_channels, out_channels, n_blocks):
    keys = jax.random.split(key, n_blocks)
    params = []
    for i in range(n_blocks):
        cin = in_channels if i == 0 else out_channels
        identity_skip = (cin == out_channels)   # stride == 1 everywhere
        params.append((init_block_params(keys[i], cin, out_channels), identity_skip))
    return params


# ---------------------------------------------------------------------------
# Pure-JAX f32 reference (lax.conv) used only for the in-script check.
# ---------------------------------------------------------------------------

def _ref_bn(x, gamma, beta):
    mean = jnp.mean(x, axis=(0, 2, 3), keepdims=True)
    var = jnp.mean(jnp.square(x - mean), axis=(0, 2, 3), keepdims=True)
    return ((x - mean) * lax.rsqrt(var + BN_EPS) * gamma[None, :, None, None]
            + beta[None, :, None, None])


def _ref_conv(x, k_hwio):
    return lax.conv_general_dilated(
        x, k_hwio, window_strides=(1, 1), padding="SAME",
        dimension_numbers=("NCHW", "HWIO", "NCHW"))


def group_of_blocks_reference(x_nchw, group_params):
    x = x_nchw
    for prm, identity in group_params:
        y = jnp.maximum(_ref_bn(_ref_conv(x, prm["w1"]), prm["g1"], prm["b1"]), 0.0)
        y = _ref_bn(_ref_conv(y, prm["w2"]), prm["g2"], prm["b2"])
        skip = x if identity else _ref_bn(
            _ref_conv(x, prm["ws"][None, None]), prm["gs"], prm["bs"])
        x = jnp.maximum(y + skip, 0.0)
    return x


if __name__ == "__main__":
    key = jax.random.PRNGKey(0)
    kx, kp = jax.random.split(key)

    # Small shapes consistent with the module: NCHW input.
    N, C_in, H, W = 2, 4, 16, 16
    C_out, n_blocks = 8, 2

    x = jax.random.normal(kx, (N, C_in, H, W), jnp.float32)
    group_params = init_group_params(kp, C_in, C_out, n_blocks)

    fwd = jax.jit(lambda xx: group_of_blocks_forward(xx, group_params))
    y = jax.block_until_ready(fwd(x))

    assert y.shape == (N, C_out, H, W), y.shape
    assert bool(jnp.all(jnp.isfinite(y)))
    assert bool(jnp.all(y >= 0.0))   # final ReLU

    # Numerical check against a pure-JAX f32 reference (the kernel uses bf16
    # MXU operands, so allow a loose tolerance).
    y_ref = jax.jit(lambda xx: group_of_blocks_reference(xx, group_params))(x)
    max_err = float(jnp.max(jnp.abs(y - y_ref)))
    assert max_err < 0.2, max_err

    print("KERNEL_OK")
</pallas_src>

<mosaic_0001>
module attributes {stable_mosaic.version = 11 : i64} {
  func.func @_group_kernel(%arg0: memref<32x128xf32, #tpu.memory_space<vmem>>, %arg1: memref<3x128x128xbf16, #tpu.memory_space<vmem>>, %arg2: memref<1x128xf32, #tpu.memory_space<vmem>>, %arg3: memref<1x128xf32, #tpu.memory_space<vmem>>, %arg4: memref<3x128x128xbf16, #tpu.memory_space<vmem>>, %arg5: memref<1x128xf32, #tpu.memory_space<vmem>>, %arg6: memref<1x128xf32, #tpu.memory_space<vmem>>, %arg7: memref<128x128xbf16, #tpu.memory_space<vmem>>, %arg8: memref<1x128xf32, #tpu.memory_space<vmem>>, %arg9: memref<1x128xf32, #tpu.memory_space<vmem>>, %arg10: memref<3x128x128xbf16, #tpu.memory_space<vmem>>, %arg11: memref<1x128xf32, #tpu.memory_space<vmem>>, %arg12: memref<1x128xf32, #tpu.memory_space<vmem>>, %arg13: memref<3x128x128xbf16, #tpu.memory_space<vmem>>, %arg14: memref<1x128xf32, #tpu.memory_space<vmem>>, %arg15: memref<1x128xf32, #tpu.memory_space<vmem>>, %arg16: memref<32x128xf32, #tpu.memory_space<vmem>>) attributes {dimension_semantics = [], scalar_prefetch = 0 : i64, scratch_operands = 0 : i64, tpu.core_type = #tpu.core_type<tc>} {
    %c0 = arith.constant 0 : index
    %c0_0 = arith.constant 0 : index
    %0 = vector.load %arg0[%c0, %c0_0] : memref<32x128xf32, #tpu.memory_space<vmem>>, vector<32x128xf32>
    %1 = tpu.iota {dimensions = array<i32: 0>} : vector<32x1xi32>
    %c16_i32 = arith.constant 16 : i32
    %c0_i32 = arith.constant 0 : i32
    %2 = arith.cmpi eq, %c16_i32, %c0_i32 : i32
    %c1_i32 = arith.constant 1 : i32
    %3 = arith.select %2, %c1_i32, %c16_i32 : i32
    %4 = vector.broadcast %3 : i32 to vector<32x1xi32>
    %5 = arith.remsi %1, %4 : vector<32x1xi32>
    %c0_i32_1 = arith.constant 0 : i32
    %6 = vector.broadcast %c0_i32_1 : i32 to vector<32x1xi32>
    %7 = arith.cmpi ne, %5, %6 : vector<32x1xi32>
    %c0_i32_2 = arith.constant 0 : i32
    %8 = vector.broadcast %c0_i32_2 : i32 to vector<32x1xi32>
    %9 = arith.cmpi slt, %5, %8 : vector<32x1xi32>
    %c0_i32_3 = arith.constant 0 : i32
    %10 = arith.cmpi slt, %3, %c0_i32_3 : i32
    %11 = vector.broadcast %10 : i1 to vector<32x1xi1>
    %12 = vector.broadcast %11 : vector<32x1xi1> to vector<32x1xi1>
    %13 = arith.xori %9, %12 : vector<32x1xi1>
    %14 = arith.andi %13, %7 : vector<32x1xi1>
    %15 = vector.broadcast %3 : i32 to vector<32x1xi32>
    %16 = arith.addi %5, %15 : vector<32x1xi32>
    %17 = arith.select %14, %16, %5 : vector<32x1xi1>, vector<32x1xi32>
    %c0_i32_4 = arith.constant 0 : i32
    %18 = vector.broadcast %c0_i32_4 : i32 to vector<32x1xi32>
    %19 = arith.cmpi eq, %17, %18 : vector<32x1xi32>
    %c16_i32_5 = arith.constant 16 : i32
    %c0_i32_6 = arith.constant 0 : i32
    %20 = arith.cmpi eq, %c16_i32_5, %c0_i32_6 : i32
    %c1_i32_7 = arith.constant 1 : i32
    %21 = arith.select %20, %c1_i32_7, %c16_i32_5 : i32
    %22 = vector.broadcast %21 : i32 to vector<32x1xi32>
    %23 = arith.remsi %1, %22 : vector<32x1xi32>
    %c0_i32_8 = arith.constant 0 : i32
    %24 = vector.broadcast %c0_i32_8 : i32 to vector<32x1xi32>
    %25 = arith.cmpi ne, %23, %24 : vector<32x1xi32>
    %c0_i32_9 = arith.constant 0 : i32
    %26 = vector.broadcast %c0_i32_9 : i32 to vector<32x1xi32>
    %27 = arith.cmpi slt, %23, %26 : vector<32x1xi32>
    %c0_i32_10 = arith.constant 0 : i32
    %28 = arith.cmpi slt, %21, %c0_i32_10 : i32
    %29 = vector.broadcast %28 : i1 to vector<32x1xi1>
    %30 = vector.broadcast %29 : vector<32x1xi1> to vector<32x1xi1>
    %31 = arith.xori %27, %30 : vector<32x1xi1>
    %32 = arith.andi %31, %25 : vector<32x1xi1>
    %33 = vector.broadcast %21 : i32 to vector<32x1xi32>
    %34 = arith.addi %23, %33 : vector<32x1xi32>
    %35 = arith.select %32, %34, %23 : vector<32x1xi1>, vector<32x1xi32>
    %c15_i32 = arith.constant 15 : i32
    %36 = vector.broadcast %c15_i32 : i32 to vector<32x1xi32>
    %37 = arith.cmpi eq, %35, %36 : vector<32x1xi32>
    %38 = arith.truncf %0 : vector<32x128xf32> to vector<32x128xbf16>
    %39 = vector.shape_cast %19 : vector<32x1xi1> to vector<32x1xi1>
    %40 = vector.broadcast %39 : vector<32x1xi1> to vector<32x128xi1>
    %41 = vector.shape_cast %37 : vector<32x1xi1> to vector<32x1xi1>
    %42 = vector.broadcast %41 : vector<32x1xi1> to vector<32x128xi1>
    %c1_i32_11 = arith.constant 1 : i32
    %43 = tpu.dynamic_rotate %0 by %c1_i32_11 dim 0 : vector<32x128xf32>, i32 -> vector<32x128xf32>
    %cst = arith.constant 0.000000e+00 : f32
    %44 = vector.broadcast %cst : f32 to vector<32x128xf32>
    %45 = arith.select %40, %44, %43 : vector<32x128xi1>, vector<32x128xf32>
    %c31_i32 = arith.constant 31 : i32
    %46 = tpu.dynamic_rotate %0 by %c31_i32 dim 0 : vector<32x128xf32>, i32 -> vector<32x128xf32>
    %cst_12 = arith.constant 0.000000e+00 : f32
    %47 = vector.broadcast %cst_12 : f32 to vector<32x128xf32>
    %48 = arith.select %42, %47, %46 : vector<32x128xi1>, vector<32x128xf32>
    %c1 = arith.constant 1 : index
    %c0_13 = arith.constant 0 : index
    %c0_14 = arith.constant 0 : index
    %49 = vector.load %arg1[%c1, %c0_13, %c0_14] : memref<3x128x128xbf16, #tpu.memory_space<vmem>>, vector<1x128x128xbf16>
    %50 = vector.shape_cast %49 : vector<1x128x128xbf16> to vector<128x128xbf16>
    %cst_15 = arith.constant dense<0.000000e+00> : vector<32x128xf32>
    %51 = tpu.matmul %38, %50, %cst_15 {dimension_numbers = #tpu.dot_dimension_numbers<[1], [0], [0], [1], [0, 0, 1, 1], [], []>} : vector<32x128xbf16>, vector<128x128xbf16>, vector<32x128xf32> -> vector<32x128xf32>
    %52 = arith.truncf %45 : vector<32x128xf32> to vector<32x128xbf16>
    %c0_16 = arith.constant 0 : index
    %c0_17 = arith.constant 0 : index
    %c0_18 = arith.constant 0 : index
    %53 = vector.load %arg1[%c0_16, %c0_17, %c0_18] : memref<3x128x128xbf16, #tpu.memory_space<vmem>>, vector<1x128x128xbf16>
    %54 = vector.shape_cast %53 : vector<1x128x128xbf16> to vector<128x128xbf16>
    %cst_19 = arith.constant dense<0.000000e+00> : vector<32x128xf32>
    %55 = tpu.matmul %52, %54, %cst_19 {dimension_numbers = #tpu.dot_dimension_numbers<[1], [0], [0], [1], [0, 0, 1, 1], [], []>} : vector<32x128xbf16>, vector<128x128xbf16>, vector<32x128xf32> -> vector<32x128xf32>
    %56 = arith.addf %51, %55 : vector<32x128xf32>
    %57 = arith.truncf %48 : vector<32x128xf32> to vector<32x128xbf16>
    %c2 = arith.constant 2 : index
    %c0_20 = arith.constant 0 : index
    %c0_21 = arith.constant 0 : index
    %58 = vector.load %arg1[%c2, %c0_20, %c0_21] : memref<3x128x128xbf16, #tpu.memory_space<vmem>>, vector<1x128x128xbf16>
    %59 = vector.shape_cast %58 : vector<1x128x128xbf16> to vector<128x128xbf16>
    %cst_22 = arith.constant dense<0.000000e+00> : vector<32x128xf32>
    %60 = tpu.matmul %57, %59, %cst_22 {dimension_numbers = #tpu.dot_dimension_numbers<[1], [0], [0], [1], [0, 0, 1, 1], [], []>} : vector<32x128xbf16>, vector<128x128xbf16>, vector<32x128xf32> -> vector<32x128xf32>
    %61 = arith.addf %56, %60 : vector<32x128xf32>
    %c0_23 = arith.constant 0 : index
    %c0_24 = arith.constant 0 : index
    %62 = vector.load %arg2[%c0_23, %c0_24] : memref<1x128xf32, #tpu.memory_space<vmem>>, vector<1x128xf32>
    %c0_25 = arith.constant 0 : index
    %c0_26 = arith.constant 0 : index
    %63 = vector.load %arg3[%c0_25, %c0_26] : memref<1x128xf32, #tpu.memory_space<vmem>>, vector<1x128xf32>
    %cst_27 = arith.constant dense<0.000000e+00> : vector<128xf32>
    %64 = vector.multi_reduction <add>, %61, %cst_27 [0] : vector<32x128xf32> to vector<128xf32>
    %65 = vector.shape_cast %64 : vector<128xf32> to vector<1x128xf32>
    %c8_i32 = arith.constant 8 : i32
    %66 = tpu.dynamic_rotate %65 by %c8_i32 dim 1 : vector<1x128xf32>, i32 -> vector<1x128xf32>
    %67 = arith.addf %65, %66 : vector<1x128xf32>
    %c16_i32_28 = arith.constant 16 : i32
    %68 = tpu.dynamic_rotate %67 by %c16_i32_28 dim 1 : vector<1x128xf32>, i32 -> vector<1x128xf32>
    %69 = arith.addf %67, %68 : vector<1x128xf32>
    %c32_i32 = arith.constant 32 : i32
    %70 = tpu.dynamic_rotate %69 by %c32_i32 dim 1 : vector<1x128xf32>, i32 -> vector<1x128xf32>
    %71 = arith.addf %69, %70 : vector<1x128xf32>
    %c64_i32 = arith.constant 64 : i32
    %72 = tpu.dynamic_rotate %71 by %c64_i32 dim 1 : vector<1x128xf32>, i32 -> vector<1x128xf32>
    %73 = arith.addf %71, %72 : vector<1x128xf32>
    %74 = arith.mulf %61, %61 : vector<32x128xf32>
    %cst_29 = arith.constant dense<0.000000e+00> : vector<128xf32>
    %75 = vector.multi_reduction <add>, %74, %cst_29 [0] : vector<32x128xf32> to vector<128xf32>
    %76 = vector.shape_cast %75 : vector<128xf32> to vector<1x128xf32>
    %c8_i32_30 = arith.constant 8 : i32
    %77 = tpu.dynamic_rotate %76 by %c8_i32_30 dim 1 : vector<1x128xf32>, i32 -> vector<1x128xf32>
    %78 = arith.addf %76, %77 : vector<1x128xf32>
    %c16_i32_31 = arith.constant 16 : i32
    %79 = tpu.dynamic_rotate %78 by %c16_i32_31 dim 1 : vector<1x128xf32>, i32 -> vector<1x128xf32>
    %80 = arith.addf %78, %79 : vector<1x128xf32>
    %c32_i32_32 = arith.constant 32 : i32
    %81 = tpu.dynamic_rotate %80 by %c32_i32_32 dim 1 : vector<1x128xf32>, i32 -> vector<1x128xf32>
    %82 = arith.addf %80, %81 : vector<1x128xf32>
    %c64_i32_33 = arith.constant 64 : i32
    %83 = tpu.dynamic_rotate %82 by %c64_i32_33 dim 1 : vector<1x128xf32>, i32 -> vector<1x128xf32>
    %84 = arith.addf %82, %83 : vector<1x128xf32>
    %cst_34 = arith.constant 0.001953125 : f32
    %85 = vector.broadcast %cst_34 : f32 to vector<1x128xf32>
    %86 = arith.mulf %73, %85 : vector<1x128xf32>
    %cst_35 = arith.constant 0.001953125 : f32
    %87 = vector.broadcast %cst_35 : f32 to vector<1x128xf32>
    %88 = arith.mulf %84, %87 : vector<1x128xf32>
    %89 = arith.mulf %86, %86 : vector<1x128xf32>
    %90 = arith.subf %88, %89 : vector<1x128xf32>
    %cst_36 = arith.constant 9.99999974E-6 : f32
    %91 = vector.broadcast %cst_36 : f32 to vector<1x128xf32>
    %92 = arith.addf %90, %91 : vector<1x128xf32>
    %93 = math.rsqrt %92 : vector<1x128xf32>
    %94 = arith.mulf %62, %93 : vector<1x128xf32>
    %95 = vector.broadcast %94 : vector<1x128xf32> to vector<32x128xf32>
    %96 = arith.mulf %61, %95 : vector<32x128xf32>
    %97 = arith.mulf %86, %94 : vector<1x128xf32>
    %98 = arith.subf %63, %97 : vector<1x128xf32>
    %99 = vector.broadcast %98 : vector<1x128xf32> to vector<32x128xf32>
    %100 = arith.addf %96, %99 : vector<32x128xf32>
    %cst_37 = arith.constant 0.000000e+00 : f32
    %101 = vector.broadcast %cst_37 : f32 to vector<32x128xf32>
    %102 = arith.maximumf %100, %101 : vector<32x128xf32>
    %103 = arith.truncf %102 : vector<32x128xf32> to vector<32x128xbf16>
    %c1_i32_38 = arith.constant 1 : i32
    %104 = tpu.dynamic_rotate %102 by %c1_i32_38 dim 0 : vector<32x128xf32>, i32 -> vector<32x128xf32>
    %cst_39 = arith.constant 0.000000e+00 : f32
    %105 = vector.broadcast %cst_39 : f32 to vector<32x128xf32>
    %106 = arith.select %40, %105, %104 : vector<32x128xi1>, vector<32x128xf32>
    %c31_i32_40 = arith.constant 31 : i32
    %107 = tpu.dynamic_rotate %102 by %c31_i32_40 dim 0 : vector<32x128xf32>, i32 -> vector<32x128xf32>
    %cst_41 = arith.constant 0.000000e+00 : f32
    %108 = vector.broadcast %cst_41 : f32 to vector<32x128xf32>
    %109 = arith.select %42, %108, %107 : vector<32x128xi1>, vector<32x128xf32>
    %c1_42 = arith.constant 1 : index
    %c0_43 = arith.constant 0 : index
    %c0_44 = arith.constant 0 : index
    %110 = vector.load %arg4[%c1_42, %c0_43, %c0_44] : memref<3x128x128xbf16, #tpu.memory_space<vmem>>, vector<1x128x128xbf16>
    %111 = vector.shape_cast %110 : vector<1x128x128xbf16> to vector<128x128xbf16>
    %cst_45 = arith.constant dense<0.000000e+00> : vector<32x128xf32>
    %112 = tpu.matmul %103, %111, %cst_45 {dimension_numbers = #tpu.dot_dimension_numbers<[1], [0], [0], [1], [0, 0, 1, 1], [], []>} : vector<32x128xbf16>, vector<128x128xbf16>, vector<32x128xf32> -> vector<32x128xf32>
    %113 = arith.truncf %106 : vector<32x128xf32> to vector<32x128xbf16>
    %c0_46 = arith.constant 0 : index
    %c0_47 = arith.constant 0 : index
    %c0_48 = arith.constant 0 : index
    %114 = vector.load %arg4[%c0_46, %c0_47, %c0_48] : memref<3x128x128xbf16, #tpu.memory_space<vmem>>, vector<1x128x128xbf16>
    %115 = vector.shape_cast %114 : vector<1x128x128xbf16> to vector<128x128xbf16>
    %cst_49 = arith.constant dense<0.000000e+00> : vector<32x128xf32>
    %116 = tpu.matmul %113, %115, %cst_49 {dimension_numbers = #tpu.dot_dimension_numbers<[1], [0], [0], [1], [0, 0, 1, 1], [], []>} : vector<32x128xbf16>, vector<128x128xbf16>, vector<32x128xf32> -> vector<32x128xf32>
    %117 = arith.addf %112, %116 : vector<32x128xf32>
    %118 = arith.truncf %109 : vector<32x128xf32> to vector<32x128xbf16>
    %c2_50 = arith.constant 2 : index
    %c0_51 = arith.constant 0 : index
    %c0_52 = arith.constant 0 : index
    %119 = vector.load %arg4[%c2_50, %c0_51, %c0_52] : memref<3x128x128xbf16, #tpu.memory_space<vmem>>, vector<1x128x128xbf16>
    %120 = vector.shape_cast %119 : vector<1x128x128xbf16> to vector<128x128xbf16>
    %cst_53 = arith.constant dense<0.000000e+00> : vector<32x128xf32>
    %121 = tpu.matmul %118, %120, %cst_53 {dimension_numbers = #tpu.dot_dimension_numbers<[1], [0], [0], [1], [0, 0, 1, 1], [], []>} : vector<32x128xbf16>, vector<128x128xbf16>, vector<32x128xf32> -> vector<32x128xf32>
    %122 = arith.addf %117, %121 : vector<32x128xf32>
    %c0_54 = arith.constant 0 : index
    %c0_55 = arith.constant 0 : index
    %123 = vector.load %arg5[%c0_54, %c0_55] : memref<1x128xf32, #tpu.memory_space<vmem>>, vector<1x128xf32>
    %c0_56 = arith.constant 0 : index
    %c0_57 = arith.constant 0 : index
    %124 = vector.load %arg6[%c0_56, %c0_57] : memref<1x128xf32, #tpu.memory_space<vmem>>, vector<1x128xf32>
    %cst_58 = arith.constant dense<0.000000e+00> : vector<128xf32>
    %125 = vector.multi_reduction <add>, %122, %cst_58 [0] : vector<32x128xf32> to vector<128xf32>
    %126 = vector.shape_cast %125 : vector<128xf32> to vector<1x128xf32>
    %c8_i32_59 = arith.constant 8 : i32
    %127 = tpu.dynamic_rotate %126 by %c8_i32_59 dim 1 : vector<1x128xf32>, i32 -> vector<1x128xf32>
    %128 = arith.addf %126, %127 : vector<1x128xf32>
    %c16_i32_60 = arith.constant 16 : i32
    %129 = tpu.dynamic_rotate %128 by %c16_i32_60 dim 1 : vector<1x128xf32>, i32 -> vector<1x128xf32>
    %130 = arith.addf %128, %129 : vector<1x128xf32>
    %c32_i32_61 = arith.constant 32 : i32
    %131 = tpu.dynamic_rotate %130 by %c32_i32_61 dim 1 : vector<1x128xf32>, i32 -> vector<1x128xf32>
    %132 = arith.addf %130, %131 : vector<1x128xf32>
    %c64_i32_62 = arith.constant 64 : i32
    %133 = tpu.dynamic_rotate %132 by %c64_i32_62 dim 1 : vector<1x128xf32>, i32 -> vector<1x128xf32>
    %134 = arith.addf %132, %133 : vector<1x128xf32>
    %135 = arith.mulf %122, %122 : vector<32x128xf32>
    %cst_63 = arith.constant dense<0.000000e+00> : vector<128xf32>
    %136 = vector.multi_reduction <add>, %135, %cst_63 [0] : vector<32x128xf32> to vector<128xf32>
    %137 = vector.shape_cast %136 : vector<128xf32> to vector<1x128xf32>
    %c8_i32_64 = arith.constant 8 : i32
    %138 = tpu.dynamic_rotate %137 by %c8_i32_64 dim 1 : vector<1x128xf32>, i32 -> vector<1x128xf32>
    %139 = arith.addf %137, %138 : vector<1x128xf32>
    %c16_i32_65 = arith.constant 16 : i32
    %140 = tpu.dynamic_rotate %139 by %c16_i32_65 dim 1 : vector<1x128xf32>, i32 -> vector<1x128xf32>
    %141 = arith.addf %139, %140 : vector<1x128xf32>
    %c32_i32_66 = arith.constant 32 : i32
    %142 = tpu.dynamic_rotate %141 by %c32_i32_66 dim 1 : vector<1x128xf32>, i32 -> vector<1x128xf32>
    %143 = arith.addf %141, %142 : vector<1x128xf32>
    %c64_i32_67 = arith.constant 64 : i32
    %144 = tpu.dynamic_rotate %143 by %c64_i32_67 dim 1 : vector<1x128xf32>, i32 -> vector<1x128xf32>
    %145 = arith.addf %143, %144 : vector<1x128xf32>
    %cst_68 = arith.constant 0.001953125 : f32
    %146 = vector.broadcast %cst_68 : f32 to vector<1x128xf32>
    %147 = arith.mulf %134, %146 : vector<1x128xf32>
    %cst_69 = arith.constant 0.001953125 : f32
    %148 = vector.broadcast %cst_69 : f32 to vector<1x128xf32>
    %149 = arith.mulf %145, %148 : vector<1x128xf32>
    %150 = arith.mulf %147, %147 : vector<1x128xf32>
    %151 = arith.subf %149, %150 : vector<1x128xf32>
    %cst_70 = arith.constant 9.99999974E-6 : f32
    %152 = vector.broadcast %cst_70 : f32 to vector<1x128xf32>
    %153 = arith.addf %151, %152 : vector<1x128xf32>
    %154 = math.rsqrt %153 : vector<1x128xf32>
    %155 = arith.mulf %123, %154 : vector<1x128xf32>
    %156 = vector.broadcast %155 : vector<1x128xf32> to vector<32x128xf32>
    %157 = arith.mulf %122, %156 : vector<32x128xf32>
    %158 = arith.mulf %147, %155 : vector<1x128xf32>
    %159 = arith.subf %124, %158 : vector<1x128xf32>
    %160 = vector.broadcast %159 : vector<1x128xf32> to vector<32x128xf32>
    %161 = arith.addf %157, %160 : vector<32x128xf32>
    %c0_71 = arith.constant 0 : index
    %c0_72 = arith.constant 0 : index
    %162 = vector.load %arg7[%c0_71, %c0_72] : memref<128x128xbf16, #tpu.memory_space<vmem>>, vector<128x128xbf16>
    %cst_73 = arith.constant dense<0.000000e+00> : vector<32x128xf32>
    %163 = tpu.matmul %38, %162, %cst_73 {dimension_numbers = #tpu.dot_dimension_numbers<[1], [0], [0], [1], [0, 0, 1, 1], [], []>} : vector<32x128xbf16>, vector<128x128xbf16>, vector<32x128xf32> -> vector<32x128xf32>
    %c0_74 = arith.constant 0 : index
    %c0_75 = arith.constant 0 : index
    %164 = vector.load %arg8[%c0_74, %c0_75] : memref<1x128xf32, #tpu.memory_space<vmem>>, vector<1x128xf32>
    %c0_76 = arith.constant 0 : index
    %c0_77 = arith.constant 0 : index
    %165 = vector.load %arg9[%c0_76, %c0_77] : memref<1x128xf32, #tpu.memory_space<vmem>>, vector<1x128xf32>
    %cst_78 = arith.constant dense<0.000000e+00> : vector<128xf32>
    %166 = vector.multi_reduction <add>, %163, %cst_78 [0] : vector<32x128xf32> to vector<128xf32>
    %167 = vector.shape_cast %166 : vector<128xf32> to vector<1x128xf32>
    %c8_i32_79 = arith.constant 8 : i32
    %168 = tpu.dynamic_rotate %167 by %c8_i32_79 dim 1 : vector<1x128xf32>, i32 -> vector<1x128xf32>
    %169 = arith.addf %167, %168 : vector<1x128xf32>
    %c16_i32_80 = arith.constant 16 : i32
    %170 = tpu.dynamic_rotate %169 by %c16_i32_80 dim 1 : vector<1x128xf32>, i32 -> vector<1x128xf32>
    %171 = arith.addf %169, %170 : vector<1x128xf32>
    %c32_i32_81 = arith.constant 32 : i32
    %172 = tpu.dynamic_rotate %171 by %c32_i32_81 dim 1 : vector<1x128xf32>, i32 -> vector<1x128xf32>
    %173 = arith.addf %171, %172 : vector<1x128xf32>
    %c64_i32_82 = arith.constant 64 : i32
    %174 = tpu.dynamic_rotate %173 by %c64_i32_82 dim 1 : vector<1x128xf32>, i32 -> vector<1x128xf32>
    %175 = arith.addf %173, %174 : vector<1x128xf32>
    %176 = arith.mulf %163, %163 : vector<32x128xf32>
    %cst_83 = arith.constant dense<0.000000e+00> : vector<128xf32>
    %177 = vector.multi_reduction <add>, %176, %cst_83 [0] : vector<32x128xf32> to vector<128xf32>
    %178 = vector.shape_cast %177 : vector<128xf32> to vector<1x128xf32>
    %c8_i32_84 = arith.constant 8 : i32
    %179 = tpu.dynamic_rotate %178 by %c8_i32_84 dim 1 : vector<1x128xf32>, i32 -> vector<1x128xf32>
    %180 = arith.addf %178, %179 : vector<1x128xf32>
    %c16_i32_85 = arith.constant 16 : i32
    %181 = tpu.dynamic_rotate %180 by %c16_i32_85 dim 1 : vector<1x128xf32>, i32 -> vector<1x128xf32>
    %182 = arith.addf %180, %181 : vector<1x128xf32>
    %c32_i32_86 = arith.constant 32 : i32
    %183 = tpu.dynamic_rotate %182 by %c32_i32_86 dim 1 : vector<1x128xf32>, i32 -> vector<1x128xf32>
    %184 = arith.addf %182, %183 : vector<1x128xf32>
    %c64_i32_87 = arith.constant 64 : i32
    %185 = tpu.dynamic_rotate %184 by %c64_i32_87 dim 1 : vector<1x128xf32>, i32 -> vector<1x128xf32>
    %186 = arith.addf %184, %185 : vector<1x128xf32>
    %cst_88 = arith.constant 0.001953125 : f32
    %187 = vector.broadcast %cst_88 : f32 to vector<1x128xf32>
    %188 = arith.mulf %175, %187 : vector<1x128xf32>
    %cst_89 = arith.constant 0.001953125 : f32
    %189 = vector.broadcast %cst_89 : f32 to vector<1x128xf32>
    %190 = arith.mulf %186, %189 : vector<1x128xf32>
    %191 = arith.mulf %188, %188 : vector<1x128xf32>
    %192 = arith.subf %190, %191 : vector<1x128xf32>
    %cst_90 = arith.constant 9.99999974E-6 : f32
    %193 = vector.broadcast %cst_90 : f32 to vector<1x128xf32>
    %194 = arith.addf %192, %193 : vector<1x128xf32>
    %195 = math.rsqrt %194 : vector<1x128xf32>
    %196 = arith.mulf %164, %195 : vector<1x128xf32>
    %197 = vector.broadcast %196 : vector<1x128xf32> to vector<32x128xf32>
    %198 = arith.mulf %163, %197 : vector<32x128xf32>
    %199 = arith.mulf %188, %196 : vector<1x128xf32>
    %200 = arith.subf %165, %199 : vector<1x128xf32>
    %201 = vector.broadcast %200 : vector<1x128xf32> to vector<32x128xf32>
    %202 = arith.addf %198, %201 : vector<32x128xf32>
    %203 = arith.addf %161, %202 : vector<32x128xf32>
    %cst_91 = arith.constant 0.000000e+00 : f32
    %204 = vector.broadcast %cst_91 : f32 to vector<32x128xf32>
    %205 = arith.maximumf %203, %204 : vector<32x128xf32>
    %206 = arith.truncf %205 : vector<32x128xf32> to vector<32x128xbf16>
    %c1_i32_92 = arith.constant 1 : i32
    %207 = tpu.dynamic_rotate %205 by %c1_i32_92 dim 0 : vector<32x128xf32>, i32 -> vector<32x128xf32>
    %cst_93 = arith.constant 0.000000e+00 : f32
    %208 = vector.broadcast %cst_93 : f32 to vector<32x128xf32>
    %209 = arith.select %40, %208, %207 : vector<32x128xi1>, vector<32x128xf32>
    %c31_i32_94 = arith.constant 31 : i32
    %210 = tpu.dynamic_rotate %205 by %c31_i32_94 dim 0 : vector<32x128xf32>, i32 -> vector<32x128xf32>
    %cst_95 = arith.constant 0.000000e+00 : f32
    %211 = vector.broadcast %cst_95 : f32 to vector<32x128xf32>
    %212 = arith.select %42, %211, %210 : vector<32x128xi1>, vector<32x128xf32>
    %c1_96 = arith.constant 1 : index
    %c0_97 = arith.constant 0 : index
    %c0_98 = arith.constant 0 : index
    %213 = vector.load %arg10[%c1_96, %c0_97, %c0_98] : memref<3x128x128xbf16, #tpu.memory_space<vmem>>, vector<1x128x128xbf16>
    %214 = vector.shape_cast %213 : vector<1x128x128xbf16> to vector<128x128xbf16>
    %cst_99 = arith.constant dense<0.000000e+00> : vector<32x128xf32>
    %215 = tpu.matmul %206, %214, %cst_99 {dimension_numbers = #tpu.dot_dimension_numbers<[1], [0], [0], [1], [0, 0, 1, 1], [], []>} : vector<32x128xbf16>, vector<128x128xbf16>, vector<32x128xf32> -> vector<32x128xf32>
    %216 = arith.truncf %209 : vector<32x128xf32> to vector<32x128xbf16>
    %c0_100 = arith.constant 0 : index
    %c0_101 = arith.constant 0 : index
    %c0_102 = arith.constant 0 : index
    %217 = vector.load %arg10[%c0_100, %c0_101, %c0_102] : memref<3x128x128xbf16, #tpu.memory_space<vmem>>, vector<1x128x128xbf16>
    %218 = vector.shape_cast %217 : vector<1x128x128xbf16> to vector<128x128xbf16>
    %cst_103 = arith.constant dense<0.000000e+00> : vector<32x128xf32>
    %219 = tpu.matmul %216, %218, %cst_103 {dimension_numbers = #tpu.dot_dimension_numbers<[1], [0], [0], [1], [0, 0, 1, 1], [], []>} : vector<32x128xbf16>, vector<128x128xbf16>, vector<32x128xf32> -> vector<32x128xf32>
    %220 = arith.addf %215, %219 : vector<32x128xf32>
    %221 = arith.truncf %212 : vector<32x128xf32> to vector<32x128xbf16>
    %c2_104 = arith.constant 2 : index
    %c0_105 = arith.constant 0 : index
    %c0_106 = arith.constant 0 : index
    %222 = vector.load %arg10[%c2_104, %c0_105, %c0_106] : memref<3x128x128xbf16, #tpu.memory_space<vmem>>, vector<1x128x128xbf16>
    %223 = vector.shape_cast %222 : vector<1x128x128xbf16> to vector<128x128xbf16>
    %cst_107 = arith.constant dense<0.000000e+00> : vector<32x128xf32>
    %224 = tpu.matmul %221, %223, %cst_107 {dimension_numbers = #tpu.dot_dimension_numbers<[1], [0], [0], [1], [0, 0, 1, 1], [], []>} : vector<32x128xbf16>, vector<128x128xbf16>, vector<32x128xf32> -> vector<32x128xf32>
    %225 = arith.addf %220, %224 : vector<32x128xf32>
    %c0_108 = arith.constant 0 : index
    %c0_109 = arith.constant 0 : index
    %226 = vector.load %arg11[%c0_108, %c0_109] : memref<1x128xf32, #tpu.memory_space<vmem>>, vector<1x128xf32>
    %c0_110 = arith.constant 0 : index
    %c0_111 = arith.constant 0 : index
    %227 = vector.load %arg12[%c0_110, %c0_111] : memref<1x128xf32, #tpu.memory_space<vmem>>, vector<1x128xf32>
    %cst_112 = arith.constant dense<0.000000e+00> : vector<128xf32>
    %228 = vector.multi_reduction <add>, %225, %cst_112 [0] : vector<32x128xf32> to vector<128xf32>
    %229 = vector.shape_cast %228 : vector<128xf32> to vector<1x128xf32>
    %c8_i32_113 = arith.constant 8 : i32
    %230 = tpu.dynamic_rotate %229 by %c8_i32_113 dim 1 : vector<1x128xf32>, i32 -> vector<1x128xf32>
    %231 = arith.addf %229, %230 : vector<1x128xf32>
    %c16_i32_114 = arith.constant 16 : i32
    %232 = tpu.dynamic_rotate %231 by %c16_i32_114 dim 1 : vector<1x128xf32>, i32 -> vector<1x128xf32>
    %233 = arith.addf %231, %232 : vector<1x128xf32>
    %c32_i32_115 = arith.constant 32 : i32
    %234 = tpu.dynamic_rotate %233 by %c32_i32_115 dim 1 : vector<1x128xf32>, i32 -> vector<1x128xf32>
    %235 = arith.addf %233, %234 : vector<1x128xf32>
    %c64_i32_116 = arith.constant 64 : i32
    %236 = tpu.dynamic_rotate %235 by %c64_i32_116 dim 1 : vector<1x128xf32>, i32 -> vector<1x128xf32>
    %237 = arith.addf %235, %236 : vector<1x128xf32>
    %238 = arith.mulf %225, %225 : vector<32x128xf32>
    %cst_117 = arith.constant dense<0.000000e+00> : vector<128xf32>
    %239 = vector.multi_reduction <add>, %238, %cst_117 [0] : vector<32x128xf32> to vector<128xf32>
    %240 = vector.shape_cast %239 : vector<128xf32> to vector<1x128xf32>
    %c8_i32_118 = arith.constant 8 : i32
    %241 = tpu.dynamic_rotate %240 by %c8_i32_118 dim 1 : vector<1x128xf32>, i32 -> vector<1x128xf32>
    %242 = arith.addf %240, %241 : vector<1x128xf32>
    %c16_i32_119 = arith.constant 16 : i32
    %243 = tpu.dynamic_rotate %242 by %c16_i32_119 dim 1 : vector<1x128xf32>, i32 -> vector<1x128xf32>
    %244 = arith.addf %242, %243 : vector<1x128xf32>
    %c32_i32_120 = arith.constant 32 : i32
    %245 = tpu.dynamic_rotate %244 by %c32_i32_120 dim 1 : vector<1x128xf32>, i32 -> vector<1x128xf32>
    %246 = arith.addf %244, %245 : vector<1x128xf32>
    %c64_i32_121 = arith.constant 64 : i32
    %247 = tpu.dynamic_rotate %246 by %c64_i32_121 dim 1 : vector<1x128xf32>, i32 -> vector<1x128xf32>
    %248 = arith.addf %246, %247 : vector<1x128xf32>
    %cst_122 = arith.constant 0.001953125 : f32
    %249 = vector.broadcast %cst_122 : f32 to vector<1x128xf32>
    %250 = arith.mulf %237, %249 : vector<1x128xf32>
    %cst_123 = arith.constant 0.001953125 : f32
    %251 = vector.broadcast %cst_123 : f32 to vector<1x128xf32>
    %252 = arith.mulf %248, %251 : vector<1x128xf32>
    %253 = arith.mulf %250, %250 : vector<1x128xf32>
    %254 = arith.subf %252, %253 : vector<1x128xf32>
    %cst_124 = arith.constant 9.99999974E-6 : f32
    %255 = vector.broadcast %cst_124 : f32 to vector<1x128xf32>
    %256 = arith.addf %254, %255 : vector<1x128xf32>
    %257 = math.rsqrt %256 : vector<1x128xf32>
    %258 = arith.mulf %226, %257 : vector<1x128xf32>
    %259 = vector.broadcast %258 : vector<1x128xf32> to vector<32x128xf32>
    %260 = arith.mulf %225, %259 : vector<32x128xf32>
    %261 = arith.mulf %250, %258 : vector<1x128xf32>
    %262 = arith.subf %227, %261 : vector<1x128xf32>
    %263 = vector.broadcast %262 : vector<1x128xf32> to vector<32x128xf32>
    %264 = arith.addf %260, %263 : vector<32x128xf32>
    %cst_125 = arith.constant 0.000000e+00 : f32
    %265 = vector.broadcast %cst_125 : f32 to vector<32x128xf32>
    %266 = arith.maximumf %264, %265 : vector<32x128xf32>
    %267 = arith.truncf %266 : vector<32x128xf32> to vector<32x128xbf16>
    %c1_i32_126 = arith.constant 1 : i32
    %268 = tpu.dynamic_rotate %266 by %c1_i32_126 dim 0 : vector<32x128xf32>, i32 -> vector<32x128xf32>
    %cst_127 = arith.constant 0.000000e+00 : f32
    %269 = vector.broadcast %cst_127 : f32 to vector<32x128xf32>
    %270 = arith.select %40, %269, %268 : vector<32x128xi1>, vector<32x128xf32>
    %c31_i32_128 = arith.constant 31 : i32
    %271 = tpu.dynamic_rotate %266 by %c31_i32_128 dim 0 : vector<32x128xf32>, i32 -> vector<32x128xf32>
    %cst_129 = arith.constant 0.000000e+00 : f32
    %272 = vector.broadcast %cst_129 : f32 to vector<32x128xf32>
    %273 = arith.select %42, %272, %271 : vector<32x128xi1>, vector<32x128xf32>
    %c1_130 = arith.constant 1 : index
    %c0_131 = arith.constant 0 : index
    %c0_132 = arith.constant 0 : index
    %274 = vector.load %arg13[%c1_130, %c0_131, %c0_132] : memref<3x128x128xbf16, #tpu.memory_space<vmem>>, vector<1x128x128xbf16>
    %275 = vector.shape_cast %274 : vector<1x128x128xbf16> to vector<128x128xbf16>
    %cst_133 = arith.constant dense<0.000000e+00> : vector<32x128xf32>
    %276 = tpu.matmul %267, %275, %cst_133 {dimension_numbers = #tpu.dot_dimension_numbers<[1], [0], [0], [1], [0, 0, 1, 1], [], []>} : vector<32x128xbf16>, vector<128x128xbf16>, vector<32x128xf32> -> vector<32x128xf32>
    %277 = arith.truncf %270 : vector<32x128xf32> to vector<32x128xbf16>
    %c0_134 = arith.constant 0 : index
    %c0_135 = arith.constant 0 : index
    %c0_136 = arith.constant 0 : index
    %278 = vector.load %arg13[%c0_134, %c0_135, %c0_136] : memref<3x128x128xbf16, #tpu.memory_space<vmem>>, vector<1x128x128xbf16>
    %279 = vector.shape_cast %278 : vector<1x128x128xbf16> to vector<128x128xbf16>
    %cst_137 = arith.constant dense<0.000000e+00> : vector<32x128xf32>
    %280 = tpu.matmul %277, %279, %cst_137 {dimension_numbers = #tpu.dot_dimension_numbers<[1], [0], [0], [1], [0, 0, 1, 1], [], []>} : vector<32x128xbf16>, vector<128x128xbf16>, vector<32x128xf32> -> vector<32x128xf32>
    %281 = arith.addf %276, %280 : vector<32x128xf32>
    %282 = arith.truncf %273 : vector<32x128xf32> to vector<32x128xbf16>
    %c2_138 = arith.constant 2 : index
    %c0_139 = arith.constant 0 : index
    %c0_140 = arith.constant 0 : index
    %283 = vector.load %arg13[%c2_138, %c0_139, %c0_140] : memref<3x128x128xbf16, #tpu.memory_space<vmem>>, vector<1x128x128xbf16>
    %284 = vector.shape_cast %283 : vector<1x128x128xbf16> to vector<128x128xbf16>
    %cst_141 = arith.constant dense<0.000000e+00> : vector<32x128xf32>
    %285 = tpu.matmul %282, %284, %cst_141 {dimension_numbers = #tpu.dot_dimension_numbers<[1], [0], [0], [1], [0, 0, 1, 1], [], []>} : vector<32x128xbf16>, vector<128x128xbf16>, vector<32x128xf32> -> vector<32x128xf32>
    %286 = arith.addf %281, %285 : vector<32x128xf32>
    %c0_142 = arith.constant 0 : index
    %c0_143 = arith.constant 0 : index
    %287 = vector.load %arg14[%c0_142, %c0_143] : memref<1x128xf32, #tpu.memory_space<vmem>>, vector<1x128xf32>
    %c0_144 = arith.constant 0 : index
    %c0_145 = arith.constant 0 : index
    %288 = vector.load %arg15[%c0_144, %c0_145] : memref<1x128xf32, #tpu.memory_space<vmem>>, vector<1x128xf32>
    %cst_146 = arith.constant dense<0.000000e+00> : vector<128xf32>
    %289 = vector.multi_reduction <add>, %286, %cst_146 [0] : vector<32x128xf32> to vector<128xf32>
    %290 = vector.shape_cast %289 : vector<128xf32> to vector<1x128xf32>
    %c8_i32_147 = arith.constant 8 : i32
    %291 = tpu.dynamic_rotate %290 by %c8_i32_147 dim 1 : vector<1x128xf32>, i32 -> vector<1x128xf32>
    %292 = arith.addf %290, %291 : vector<1x128xf32>
    %c16_i32_148 = arith.constant 16 : i32
    %293 = tpu.dynamic_rotate %292 by %c16_i32_148 dim 1 : vector<1x128xf32>, i32 -> vector<1x128xf32>
    %294 = arith.addf %292, %293 : vector<1x128xf32>
    %c32_i32_149 = arith.constant 32 : i32
    %295 = tpu.dynamic_rotate %294 by %c32_i32_149 dim 1 : vector<1x128xf32>, i32 -> vector<1x128xf32>
    %296 = arith.addf %294, %295 : vector<1x128xf32>
    %c64_i32_150 = arith.constant 64 : i32
    %297 = tpu.dynamic_rotate %296 by %c64_i32_150 dim 1 : vector<1x128xf32>, i32 -> vector<1x128xf32>
    %298 = arith.addf %296, %297 : vector<1x128xf32>
    %299 = arith.mulf %286, %286 : vector<32x128xf32>
    %cst_151 = arith.constant dense<0.000000e+00> : vector<128xf32>
    %300 = vector.multi_reduction <add>, %299, %cst_151 [0] : vector<32x128xf32> to vector<128xf32>
    %301 = vector.shape_cast %300 : vector<128xf32> to vector<1x128xf32>
    %c8_i32_152 = arith.constant 8 : i32
    %302 = tpu.dynamic_rotate %301 by %c8_i32_152 dim 1 : vector<1x128xf32>, i32 -> vector<1x128xf32>
    %303 = arith.addf %301, %302 : vector<1x128xf32>
    %c16_i32_153 = arith.constant 16 : i32
    %304 = tpu.dynamic_rotate %303 by %c16_i32_153 dim 1 : vector<1x128xf32>, i32 -> vector<1x128xf32>
    %305 = arith.addf %303, %304 : vector<1x128xf32>
    %c32_i32_154 = arith.constant 32 : i32
    %306 = tpu.dynamic_rotate %305 by %c32_i32_154 dim 1 : vector<1x128xf32>, i32 -> vector<1x128xf32>
    %307 = arith.addf %305, %306 : vector<1x128xf32>
    %c64_i32_155 = arith.constant 64 : i32
    %308 = tpu.dynamic_rotate %307 by %c64_i32_155 dim 1 : vector<1x128xf32>, i32 -> vector<1x128xf32>
    %309 = arith.addf %307, %308 : vector<1x128xf32>
    %cst_156 = arith.constant 0.001953125 : f32
    %310 = vector.broadcast %cst_156 : f32 to vector<1x128xf32>
    %311 = arith.mulf %298, %310 : vector<1x128xf32>
    %cst_157 = arith.constant 0.001953125 : f32
    %312 = vector.broadcast %cst_157 : f32 to vector<1x128xf32>
    %313 = arith.mulf %309, %312 : vector<1x128xf32>
    %314 = arith.mulf %311, %311 : vector<1x128xf32>
    %315 = arith.subf %313, %314 : vector<1x128xf32>
    %cst_158 = arith.constant 9.99999974E-6 : f32
    %316 = vector.broadcast %cst_158 : f32 to vector<1x128xf32>
    %317 = arith.addf %315, %316 : vector<1x128xf32>
    %318 = math.rsqrt %317 : vector<1x128xf32>
    %319 = arith.mulf %287, %318 : vector<1x128xf32>
    %320 = vector.broadcast %319 : vector<1x128xf32> to vector<32x128xf32>
    %321 = arith.mulf %286, %320 : vector<32x128xf32>
    %322 = arith.mulf %311, %319 : vector<1x128xf32>
    %323 = arith.subf %288, %322 : vector<1x128xf32>
    %324 = vector.broadcast %323 : vector<1x128xf32> to vector<32x128xf32>
    %325 = arith.addf %321, %324 : vector<32x128xf32>
    %326 = arith.addf %325, %205 : vector<32x128xf32>
    %cst_159 = arith.constant 0.000000e+00 : f32
    %327 = vector.broadcast %cst_159 : f32 to vector<32x128xf32>
    %328 = arith.maximumf %326, %327 : vector<32x128xf32>
    %c0_160 = arith.constant 0 : index
    %c0_161 = arith.constant 0 : index
    %329 = vector.load %arg16[%c0_160, %c0_161] : memref<32x128xf32, #tpu.memory_space<vmem>>, vector<32x128xf32>
    tpu.vector_store %arg16[%c0_160, %c0_161], %328 {strides = array<i32>} : memref<32x128xf32, #tpu.memory_space<vmem>>, vector<32x128xf32>,
    return
  }
}

</mosaic_0001>

<bundles_post_ra>
// kernel: tile.42
= control target key start
LH: loop header
LB: loop body
LE: loop exit
PB: predicated region body
PF: predicated region fallthrough
CT: control target
= control target key end

     0   :  { %s28_s0 = inlined_call_operand.vmem [shape: f32[8], index: 0, kind: input, shape index: {}]   ;;  %s29_s1 = inlined_call_operand.vmem [shape: f32[16,8], index: 1, kind: output, shape index: {}]  }
   0x1   :  { %v4_v0 = vld [vmem:[%s28_s0] ss:$0 sm:$0xff] }
   0x2   :  { %5 = vst [vmem:[%s29_s1] sm:$0xff] %v4_v0  ;;  %8 = vst [vmem:[%s29_s1 + $0x8] sm:$0xff] %v4_v0 }

// kernel: tile.43
= control target key start
LH: loop header
LB: loop body
LE: loop exit
PB: predicated region body
PF: predicated region fallthrough
CT: control target
= control target key end

     0   :  { %s131_s10 = smov 120   ;;  %s132_s11 = smov 104   ;;  %vm3_vm0 = vcmask 64512   ;;  %vm9_vm1 = vcmask 1048512   ;;  %vm15_vm2 = vcmask 982912   ;;  %vm21_vm3 = vcmask 917312   ;;  %s207_s0 = inlined_call_operand.vmem [shape: f32[16,8], index: 0, kind: input, shape index: {}]   ;;  %s208_s1 = inlined_call_operand.vmem [shape: f32[1,128], index: 1, kind: output, shape index: {}]  }
   0x1   :  { %v101_v0 = vld [vmem:[%s207_s0 + $0xf] sm:$0x1]   ;;  %v103_v1 = vld [vmem:[%s207_s0 + $0xd] sm:$0x1]   ;;  %v102_v2 = vld [vmem:[%s207_s0 + $0xe] sm:$0x1]  }
   0x2   :  { %7 = vrot.lane.b32.xlu0 %v101_v0, %s131_s10  ;;  %19 = vrot.lane.b32.xlu1 %v103_v1, %s132_s11  ;;  %v104_v3 = vld [vmem:[%s207_s0 + $0xc] sm:$0x1]   ;;  %s133_s16 = smov 112   ;;  %s134_s17 = smov 96   ;;  %v105_v4 = vld [vmem:[%s207_s0 + $0xb] sm:$0x1]  }
   0x3   :  { %v106_v5 = vld [vmem:[%s207_s0 + $0xa] sm:$0x1]   ;;  %v2_v6 = vld [vmem:[%s207_s0] sm:$0x1]   ;;  %s135_s24 = smov 88   ;;  %s136_s25 = smov 80  }
   0x4   :  { %4 = vst.msk [vmem:[#allocation0] sm:$0x1] %vm3_vm0, %v2_v6   ;;  %v107_v7 = vld [vmem:[%s207_s0 + $0x9] sm:$0x1]   ;;  %v108_v8 = vld [vmem:[%s207_s0 + $0x8] sm:$0x1]  }
   0x5   :  { %s137_s30 = smov 72   ;;  %s138_s2 = smov 64   ;;  %v109_v9 = vld [vmem:[%s207_s0 + $0x7] sm:$0x1]   ;;  %v110_v10 = vld [vmem:[%s207_s0 + $0x6] sm:$0x1]  }
   0x6   :  { %13 = vrot.lane.b32.xlu0 %v102_v2, %s133_s16  ;;  %25 = vrot.lane.b32.xlu1 %v104_v3, %s134_s17  ;;  %s139_s7 = smov 56   ;;  %s140_s8 = smov 48   ;;  %v111_v11 = vld [vmem:[%s207_s0 + $0x5] sm:$0x1]   ;;  %v112_v12 = vld [vmem:[%s207_s0 + $0x4] sm:$0x1]  }
   0x7   :  { %s141_s13 = smov 40   ;;  %s142_s14 = smov 32   ;;  %v113_v13 = vld [vmem:[%s207_s0 + $0x3] sm:$0x1]   ;;  %v114_v14 = vld [vmem:[%s207_s0 + $0x2] sm:$0x1]  }
   0x8   :  { %s143_s19 = smov 24   ;;  %s144_s20 = smov 16   ;;  %v115_v15 = vld [vmem:[%s207_s0 + $0x1] sm:$0x1]   ;;  %vm27_vm4 = vcmask 851712   ;;  %vm33_vm5 = vcmask 786112  }
   0x9   :  { %s145_s0 = smov 8   ;;  %vm39_vm6 = vcmask 720512   ;;  %vm45_vm7 = vcmask 654912   ;;  %vm51_vm8 = vcmask 589312   ;;  %vm57_vm9 = vcmask 523712  }
   0xa   :  { %31 = vrot.lane.b32.xlu0 %v105_v4, %s135_s24  ;;  %37 = vrot.lane.b32.xlu1 %v106_v5, %s136_s25  ;;  %vm63_vm10 = vcmask 458112   ;;  %vm69_vm11 = vcmask 392512   ;;  %vm75_vm12 = vcmask 326912   ;;  %vm81_vm13 = vcmask 261312  }
   0xb   :  { %vm87_vm14 = vcmask 195712   ;;  %vm93_vm15 = vcmask 130112  }
   0xe   :  { %43 = vrot.lane.b32.xlu0 %v107_v7, %s137_s30  ;;  %49 = vrot.lane.b32.xlu1 %v108_v8, %s138_s2 }
  0x12   :  { %55 = vrot.lane.b32.xlu0 %v109_v9, %s139_s7  ;;  %61 = vrot.lane.b32.xlu1 %v110_v10, %s140_s8 }
  0x16   :  { %67 = vrot.lane.b32.xlu0 %v111_v11, %s141_s13  ;;  %73 = vrot.lane.b32.xlu1 %v112_v12, %s142_s14 }
  0x1a   :  { %79 = vrot.lane.b32.xlu0 %v113_v13, %s143_s19  ;;  %85 = vrot.lane.b32.xlu1 %v114_v14, %s144_s20 }
  0x1e   :  { %91 = vrot.lane.b32.xlu0 %v115_v15, %s145_s0 }
  0x74   :  { %v8_v16 = vpop.permute.xlu0 %7   ;;  %v20_v17 = vpop.permute.xlu1 %19  }
  0x75   :  { %10 = vst.msk [vmem:[#allocation0] sm:$0x1] %vm9_vm1, %v8_v16  }
  0x78   :  { %v14_v18 = vpop.permute.xlu0 %13   ;;  %v26_v19 = vpop.permute.xlu1 %25  }
  0x79   :  { %16 = vst.msk [vmem:[#allocation0] sm:$0x1] %vm15_vm2, %v14_v18  }
  0x7a   :  { %22 = vst.msk [vmem:[#allocation0] sm:$0x1] %vm21_vm3, %v20_v17  }
  0x7b   :  { %28 = vst.msk [vmem:[#allocation0] sm:$0x1] %vm27_vm4, %v26_v19  }
  0x7c   :  { %v32_v20 = vpop.permute.xlu0 %31   ;;  %v38_v21 = vpop.permute.xlu1 %37  }
  0x7d   :  { %34 = vst.msk [vmem:[#allocation0] sm:$0x1] %vm33_vm5, %v32_v20  }
  0x7e   :  { %40 = vst.msk [vmem:[#allocation0] sm:$0x1] %vm39_vm6, %v38_v21  }
  0x80   :  { %v44_v22 = vpop.permute.xlu0 %43   ;;  %v50_v23 = vpop.permute.xlu1 %49  }
  0x81   :  { %46 = vst.msk [vmem:[#allocation0] sm:$0x1] %vm45_vm7, %v44_v22  }
  0x82   :  { %52 = vst.msk [vmem:[#allocation0] sm:$0x1] %vm51_vm8, %v50_v23  }
  0x84   :  { %v56_v24 = vpop.permute.xlu0 %55   ;;  %v62_v25 = vpop.permute.xlu1 %61  }
  0x85   :  { %58 = vst.msk [vmem:[#allocation0] sm:$0x1] %vm57_vm9, %v56_v24  }
  0x86   :  { %64 = vst.msk [vmem:[#allocation0] sm:$0x1] %vm63_vm10, %v62_v25  }
  0x88   :  { %v68_v26 = vpop.permute.xlu0 %67   ;;  %v74_v27 = vpop.permute.xlu1 %73  }
  0x89   :  { %70 = vst.msk [vmem:[#allocation0] sm:$0x1] %vm69_vm11, %v68_v26  }
  0x8a   :  { %76 = vst.msk [vmem:[#allocation0] sm:$0x1] %vm75_vm12, %v74_v27  }
  0x8c   :  { %v80_v28 = vpop.permute.xlu0 %79   ;;  %v86_v29 = vpop.permute.xlu1 %85  }
  0x8d   :  { %82 = vst.msk [vmem:[#allocation0] sm:$0x1] %vm81_vm13, %v80_v28  }
  0x8e   :  { %88 = vst.msk [vmem:[#allocation0] sm:$0x1] %vm87_vm14, %v86_v29  }
  0x90   :  { %v92_v30 = vpop.permute.xlu0 %91  }
  0x91   :  { %94 = vst.msk [vmem:[#allocation0] sm:$0x1] %vm93_vm15, %v92_v30  }
  0x98   :  { %v98_v31 = vld [vmem:[#allocation0] sm:$0x1] }
  0x99   :  { %100 = vst [vmem:[%s208_s1] sm:$0x1] %v98_v31 }

// kernel: _lambda_.1
= control target key start
LH: loop header
LB: loop body
LE: loop exit
PB: predicated region body
PF: predicated region fallthrough
CT: control target
= control target key end

     0   :  { %v58_v0 = vlaneseq  ;;  %vm3008_vm2 = vmmov 1   ;;  %s3009_s18 = smov 8   ;;  %s3010_s19 = smov 16   ;;  %s3837_s1 = inlined_call_operand.vmem [shape: bf16[3,128,128], index: 1, kind: input, shape index: {}]   ;;  %s3838_s0 = inlined_call_operand.vmem [shape: f32[32,128], index: 0, kind: input, shape index: {}]   ;;  %s3839_s7 = inlined_call_operand.vmem [shape: bf16[128,128], index: 7, kind: input, shape index: {}]   ;;  %s3840_s4 = inlined_call_operand.vmem [shape: bf16[3,128,128], index: 4, kind: input, shape index: {}]   ;;  %s3841_s2 = inlined_call_operand.vmem [shape: f32[1,128], index: 2, kind: input, shape index: {}]   ;;  %s3842_s3 = inlined_call_operand.vmem [shape: f32[1,128], index: 3, kind: input, shape index: {}]   ;;  %s3843_s10 = inlined_call_operand.vmem [shape: bf16[3,128,128], index: 10, kind: input, shape index: {}]   ;;  %s3844_s8 = inlined_call_operand.vmem [shape: f32[1,128], index: 8, kind: input, shape index: {}]   ;;  %s3845_s9 = inlined_call_operand.vmem [shape: f32[1,128], index: 9, kind: input, shape index: {}]   ;;  %s3846_s5 = inlined_call_operand.vmem [shape: f32[1,128], index: 5, kind: input, shape index: {}]   ;;  %s3847_s6 = inlined_call_operand.vmem [shape: f32[1,128], index: 6, kind: input, shape index: {}]   ;;  %s3848_s13 = inlined_call_operand.vmem [shape: bf16[3,128,128], index: 13, kind: input, shape index: {}]   ;;  %s3849_s11 = inlined_call_operand.vmem [shape: f32[1,128], index: 11, kind: input, shape index: {}]   ;;  %s3850_s12 = inlined_call_operand.vmem [shape: f32[1,128], index: 12, kind: input, shape index: {}]   ;;  %s3851_s14 = inlined_call_operand.vmem [shape: f32[1,128], index: 14, kind: input, shape index: {}]   ;;  %s3852_s15 = inlined_call_operand.vmem [shape: f32[1,128], index: 15, kind: input, shape index: {}]   ;;  %s3853_s16 = inlined_call_operand.vmem [shape: f32[32,128], index: 16, kind: output, shape index: {}]  }
   0x1   :  { %3855 = sst [smem:[#allocation2_spill]] %s3837_s1  ;;  %v3116_v7 = vld [vmem:[%s3838_s0] sm:$0xff]  ;;  %v3121_v8 = vld [vmem:[%s3838_s0 + $0x8] sm:$0xff]  ;;  %v3126_v9 = vld [vmem:[%s3838_s0 + $0x18] sm:$0xff]  ;;  %s3012_s24 = smov 64  }
   0x2   :  { %s3856_s23 = sld [smem:[#allocation2_spill]]  ;;  %v3104_v3 = vshrl.u32 %v58_v0, 7  ;;  %v137_v10 = vrot.slane %v3116_v7, 7  ;;  %v138_v11 = vrot.slane %v3121_v8, 7  ;;  %v140_v12 = vrot.slane %v3126_v9, 7  ;;  %v3157_v22 = vld [vmem:[%s3838_s0 + $0x10] sm:$0xff] }
   0x3   :  { %v139_v25 = vrot.slane %v3157_v22, 7  ;;  %v3182_v33 = vpack.c.bf16 %v3121_v8, %v3116_v7  ;;  %v150_v41 = vrot.slane %v3116_v7, 1  ;;  %v151_v42 = vrot.slane %v3121_v8, 1  ;;  %v2918_v63 = vld [vmem:[%s3839_s7] sm:$0xff]   ;;  %v2919_v0 = vld [vmem:[%s3839_s7 + $0x8] sm:$0xff]   ;;  %v2984_v15 = vld [vmem:[%s3848_s13 + $0x50] sm:$0xff]  }
   0x4   :  { %v67_v5 = vand.u32 15, %v3104_v3  ;;  %vm141_vm0 = vcmp.lt.s32.totalorder %v3104_v3, 1  ;;  %v62_v19 = vadd.s32 24, %v3104_v3  ;;  %v61_v21 = vadd.s32 16, %v3104_v3  ;;  %v2985_v32 = vld [vmem:[%s3848_s13 + $0x58] sm:$0xff]   ;;  %v2995_v52 = vld [vmem:[%s3848_s13 + $0xa8] sm:$0xff]  }
   0x5   :  { %v144_v13 = vsel %vm141_vm0, %v137_v10, %v138_v11  ;;  %v145_v14 = vsel %vm141_vm0, %v140_v12, %v137_v10  ;;  %v142_v27 = vsel %vm141_vm0, %v139_v25, %v140_v12  ;;  %v143_v28 = vsel %vm141_vm0, %v138_v11, %v139_v25 }
   0x6   :  { %vm2463_vm1 = vcmp.ne.s32.totalorder %v67_v5, 0  ;;  %v2193_v17 = vpack.c.bf16 %v144_v13, %v145_v14  ;;  %v88_v23 = vand.u32 15, %v62_v19  ;;  %v81_v26 = vand.u32 15, %v61_v21  ;;  %v2923_v5 = vld [vmem:[%s3839_s7 + $0x28] sm:$0xff]  }
   0x7   :  { %vm3137_vm3 = vmpackc.low %vm3008_vm2, %vm2463_vm1  ;;  %v2197_v31 = vpack.c.bf16 %v142_v27, %v143_v28  ;;  %v60_v40 = vadd.s32 8, %v3104_v3  ;;  %v152_v44 = vrot.slane %v3157_v22, 1  ;;  %vm154_vm8 = vcmp.lt.s32.totalorder %v3104_v3, 7  ;;  %v2925_v27 = vld [vmem:[%s3839_s7 + $0x38] sm:$0xff]  }
   0x8   :  { %v2894_v1 = vld [vmem:[%s3856_s23] sm:$0xff]   ;;  %v2895_v2 = vld [vmem:[%s3856_s23 + $0x8] sm:$0xff]   ;;  %v2896_v4 = vld [vmem:[%s3856_s23 + $0x10] sm:$0xff]   ;;  %2613 = vmatprep.mubr.msk.bf16.mxu0 %vm3137_vm3, %v2193_v17  ;;  %vm2466_vm4 = vcmp.ne.s32.totalorder %v88_v23, 15  ;;  %vm2464_vm6 = vcmp.ne.s32.totalorder %v81_v26, 0  ;;  %v157_v48 = vsel %vm154_vm8, %v150_v41, %v151_v42  ;;  %v3222_v49 = vpack.c.bf16 %v3126_v9, %v3157_v22 }
   0x9   :  { %2597 = vmatprep.subr.bf16.mxu0 %v2894_v1  ;;  %v2897_v6 = vld [vmem:[%s3856_s23 + $0x18] sm:$0xff]   ;;  %v2898_v16 = vld [vmem:[%s3856_s23 + $0x20] sm:$0xff]   ;;  %v2899_v18 = vld [vmem:[%s3856_s23 + $0x28] sm:$0xff]   ;;  %v74_v45 = vand.u32 15, %v60_v40  ;;  %v156_v47 = vsel %vm154_vm8, %v151_v42, %v152_v44  ;;  %v153_v58 = vrot.slane %v3126_v9, 1 }
   0xa   :  { %2598 = vmatpush3.bf16.msra.mxu0 %v2894_v1  ;;  %v2900_v20 = vld [vmem:[%s3856_s23 + $0x30] sm:$0xff]   ;;  %v2901_v24 = vld [vmem:[%s3856_s23 + $0x38] sm:$0xff]   ;;  %vm3168_vm5 = vmpackc.low %vm2466_vm4, %vm3008_vm2  ;;  %v2233_v50 = vpack.c.bf16 %v156_v47, %v157_v48 }
   0xb   :  { %2599 = vmatprep.subr.bf16.mxu0 %v2895_v2  ;;  %v2902_v30 = vld [vmem:[%s3856_s23 + $0x40] sm:$0xff]   ;;  %vm3176_vm7 = vmpackc.low %vm3008_vm2, %vm2464_vm6  ;;  %v2903_v34 = vld [vmem:[%s3856_s23 + $0x48] sm:$0xff]   ;;  %vm2465_vm9 = vcmp.ne.s32.totalorder %v74_v45, 15  ;;  %v155_v60 = vsel %vm154_vm8, %v152_v44, %v153_v58  ;;  %v158_v61 = vsel %vm154_vm8, %v153_v58, %v150_v41 }
   0xc   :  { %v2904_v35 = vld [vmem:[%s3856_s23 + $0x50] sm:$0xff]   ;;  %v2905_v36 = vld [vmem:[%s3856_s23 + $0x58] sm:$0xff]   ;;  %v2906_v37 = vld [vmem:[%s3856_s23 + $0x60] sm:$0xff]   ;;  %v2237_v62 = vpack.c.bf16 %v158_v61, %v155_v60 }
   0xd   :  { %v2907_v38 = vld [vmem:[%s3856_s23 + $0x68] sm:$0xff]   ;;  %v2908_v39 = vld [vmem:[%s3856_s23 + $0x70] sm:$0xff]   ;;  %v2909_v43 = vld [vmem:[%s3856_s23 + $0x78] sm:$0xff]  }
   0xe   :  { %2600 = vmatpush3.bf16.msra.mxu0 %v2895_v2  ;;  %v2910_v46 = vld [vmem:[%s3856_s23 + $0x80] sm:$0xff]   ;;  %v2911_v51 = vld [vmem:[%s3856_s23 + $0x88] sm:$0xff]   ;;  %vm3228_vm10 = vmpackc.low %vm2465_vm9, %vm3008_vm2 }
   0xf   :  { %2601 = vmatprep.subr.bf16.mxu0 %v2896_v4  ;;  %v2912_v53 = vld [vmem:[%s3856_s23 + $0x90] sm:$0xff]   ;;  %v2913_v54 = vld [vmem:[%s3856_s23 + $0x98] sm:$0xff]   ;;  %v2914_v55 = vld [vmem:[%s3856_s23 + $0xa0] sm:$0xff]  }
  0x10   :  { %v2915_v56 = vld [vmem:[%s3856_s23 + $0xa8] sm:$0xff]   ;;  %v2916_v57 = vld [vmem:[%s3856_s23 + $0xb0] sm:$0xff]   ;;  %v2917_v59 = vld [vmem:[%s3856_s23 + $0xb8] sm:$0xff]  }
  0x11   :  { %v2920_v1 = vld [vmem:[%s3839_s7 + $0x10] sm:$0xff]   ;;  %v2921_v2 = vld [vmem:[%s3839_s7 + $0x18] sm:$0xff]  }
  0x12   :  { %2602 = vmatpush3.bf16.msra.mxu0 %v2896_v4  ;;  %v2922_v4 = vld [vmem:[%s3839_s7 + $0x20] sm:$0xff]   ;;  %v2924_v22 = vld [vmem:[%s3839_s7 + $0x30] sm:$0xff]   ;;  %s3011_s7 = smov 32  }
  0x13   :  { %2603 = vmatprep.subr.bf16.mxu0 %v2897_v6 }
  0x16   :  { %2604 = vmatpush3.bf16.msra.mxu0 %v2897_v6 }
  0x17   :  { %2605 = vmatprep.subr.bf16.mxu0 %v2898_v16 }
  0x1a   :  { %2606 = vmatpush3.bf16.msra.mxu0 %v2898_v16 }
  0x1b   :  { %2607 = vmatprep.subr.bf16.mxu0 %v2899_v18 }
  0x1e   :  { %2608 = vmatpush3.bf16.msra.mxu0 %v2899_v18 }
  0x1f   :  { %2609 = vmatprep.subr.bf16.mxu0 %v2900_v20 }
  0x22   :  { %2610 = vmatpush3.bf16.msra.mxu0 %v2900_v20 }
  0x23   :  { %2611 = vmatprep.subr.bf16.mxu0 %v2901_v24 }
  0x26   :  { %2612 = vmatpush3.bf16.msra.mxu0 %v2901_v24 }
  0x27   :  { %2617 = vmatprep.subr.bf16.mxu0 %v2902_v30 }
  0x29   :  { %2614 = vmatmul.mubr.msk.bf16.vlgmr.msra.gmra.mrb[0].mxu0 %vm3176_vm7, %v2197_v31 }
  0x2a   :  { %2618 = vmatpush3.bf16.msra.mxu0 %v2902_v30  ;;  %2633 = vmatprep.mubr.bf16.mxu0 %v3182_v33 }
  0x2b   :  { %2619 = vmatprep.subr.bf16.mxu0 %v2903_v34 }
  0x2e   :  { %2620 = vmatpush3.bf16.msra.mxu0 %v2903_v34 }
  0x2f   :  { %2621 = vmatprep.subr.bf16.mxu0 %v2904_v35 }
  0x32   :  { %2622 = vmatpush3.bf16.msra.mxu0 %v2904_v35 }
  0x33   :  { %2623 = vmatprep.subr.bf16.mxu0 %v2905_v36 }
  0x36   :  { %2624 = vmatpush3.bf16.msra.mxu0 %v2905_v36 }
  0x37   :  { %2625 = vmatprep.subr.bf16.mxu0 %v2906_v37 }
  0x3a   :  { %2626 = vmatpush3.bf16.msra.mxu0 %v2906_v37 }
  0x3b   :  { %2627 = vmatprep.subr.bf16.mxu0 %v2907_v38 }
  0x3e   :  { %2628 = vmatpush3.bf16.msra.mxu0 %v2907_v38 }
  0x3f   :  { %2629 = vmatprep.subr.bf16.mxu0 %v2908_v39 }
  0x42   :  { %2630 = vmatpush3.bf16.msra.mxu0 %v2908_v39 }
  0x43   :  { %2631 = vmatprep.subr.bf16.mxu0 %v2909_v43 }
  0x46   :  { %2632 = vmatpush3.bf16.msra.mxu0 %v2909_v43 }
  0x47   :  { %2637 = vmatprep.subr.bf16.mxu0 %v2910_v46 }
  0x49   :  { %2634 = vmatmul.mubr.bf16.vlgmr.msra.gmra.mrb[0].mxu0 %v3222_v49 }
  0x4a   :  { %2638 = vmatpush3.bf16.msra.mxu0 %v2910_v46  ;;  %2653 = vmatprep.mubr.msk.bf16.mxu0 %vm3228_vm10, %v2233_v50 }
  0x4b   :  { %2639 = vmatprep.subr.bf16.mxu0 %v2911_v51 }
  0x4e   :  { %2640 = vmatpush3.bf16.msra.mxu0 %v2911_v51 }
  0x4f   :  { %2641 = vmatprep.subr.bf16.mxu0 %v2912_v53 }
  0x52   :  { %2642 = vmatpush3.bf16.msra.mxu0 %v2912_v53 }
  0x53   :  { %2643 = vmatprep.subr.bf16.mxu0 %v2913_v54 }
  0x56   :  { %2644 = vmatpush3.bf16.msra.mxu0 %v2913_v54 }
  0x57   :  { %2645 = vmatprep.subr.bf16.mxu0 %v2914_v55 }
  0x5a   :  { %2646 = vmatpush3.bf16.msra.mxu0 %v2914_v55 }
  0x5b   :  { %2647 = vmatprep.subr.bf16.mxu0 %v2915_v56 }
  0x5e   :  { %2648 = vmatpush3.bf16.msra.mxu0 %v2915_v56 }
  0x5f   :  { %2649 = vmatprep.subr.bf16.mxu0 %v2916_v57 }
  0x62   :  { %2650 = vmatpush3.bf16.msra.mxu0 %v2916_v57 }
  0x63   :  { %2651 = vmatprep.subr.bf16.mxu0 %v2917_v59 }
  0x66   :  { %2652 = vmatpush3.bf16.msra.mxu0 %v2917_v59 }
  0x67   :  { %2717 = vmatprep.subr.bf16.mxu0 %v2918_v63 }
  0x69   :  { %2654 = vmatmul.mubr.msk.bf16.vlgmr.msra.gmra.mrb[0].mxu0 %vm3168_vm5, %v2237_v62 }
  0x6a   :  { %2733 = vmatprep.mubr.bf16.mxu0 %v3182_v33  ;;  %2718 = vmatpush3.bf16.msra.mxu0 %v2918_v63 }
  0x6b   :  { %2719 = vmatprep.subr.bf16.mxu0 %v2919_v0 }
  0x6e   :  { %2720 = vmatpush3.bf16.msra.mxu0 %v2919_v0 }
  0x6f   :  { %2721 = vmatprep.subr.bf16.mxu0 %v2920_v1 }
  0x72   :  { %2722 = vmatpush3.bf16.msra.mxu0 %v2920_v1 }
  0x73   :  { %2723 = vmatprep.subr.bf16.mxu0 %v2921_v2 }
  0x76   :  { %2724 = vmatpush3.bf16.msra.mxu0 %v2921_v2 }
  0x77   :  { %2725 = vmatprep.subr.bf16.mxu0 %v2922_v4 }
  0x7a   :  { %2726 = vmatpush3.bf16.msra.mxu0 %v2922_v4  ;;  %v2926_v4 = vld [vmem:[%s3840_s4] sm:$0xff]  }
  0x7b   :  { %2727 = vmatprep.subr.bf16.mxu0 %v2923_v5  ;;  %2657 = vmatprep.subr.bf16.mxu1 %v2926_v4 }
  0x7c   :  { %2658 = vmatpush3.bf16.msra.mxu1 %v2926_v4 }
  0x7e   :  { %2728 = vmatpush3.bf16.msra.mxu0 %v2923_v5 }
  0x7f   :  { %2729 = vmatprep.subr.bf16.mxu0 %v2924_v22 }
  0x82   :  { %2730 = vmatpush3.bf16.msra.mxu0 %v2924_v22  ;;  %v2930_v22 = vld [vmem:[%s3840_s4 + $0x20] sm:$0xff]  }
  0x83   :  { %2731 = vmatprep.subr.bf16.mxu0 %v2925_v27 }
  0x86   :  { %2732 = vmatpush3.bf16.msra.mxu0 %v2925_v27 }
  0x89   :  { %2734 = vmatmul.mubr.bf16.vlgmr.msra.gmra.mrb[4].mxu0 %v3222_v49 }
 0x13c   :  { %v3279_v6 = vpop.f32.mrb[0].mxu0 }
 0x13d   :  { %v3281_v7 = vpop.f32.mrb[1].mxu0  ;;  %v537_v13 = vmul.f32 %v3279_v6, %v3279_v6 }
 0x13e   :  { %v3283_v8 = vpop.f32.mrb[2].mxu0  ;;  %v535_v10 = vmul.f32 %v3281_v7, %v3281_v7 }
 0x13f   :  { %v3285_v9 = vpop.f32.mrb[3].mxu0  ;;  %v538_v17 = vmul.f32 %v3283_v8, %v3283_v8 }
 0x140   :  { %v514_v11 = vadd.f32 %v3285_v9, %v3281_v7  ;;  %v536_v12 = vmul.f32 %v3285_v9, %v3285_v9 }
 0x142   :  { %v515_v14 = vadd.f32 %v3279_v6, %v514_v11  ;;  %v539_v16 = vadd.f32 %v536_v12, %v535_v10  ;;  %v2927_v12 = vld [vmem:[%s3840_s4 + $0x8] sm:$0xff]  }
 0x143   :  { %2659 = vmatprep.subr.bf16.mxu1 %v2927_v12 }
 0x144   :  { %v540_v18 = vadd.f32 %v539_v16, %v537_v13  ;;  %v516_v19 = vadd.f32 %v3283_v8, %v515_v14  ;;  %2660 = vmatpush3.bf16.msra.mxu1 %v2927_v12 }
 0x146   :  { %v541_v20 = vadd.f32 %v540_v18, %v538_v17  ;;  %v517_v21 = vrot.slane %v516_v19, 4  ;;  %v2928_v17 = vld [vmem:[%s3840_s4 + $0x10] sm:$0xff]  }
 0x147   :  { %2661 = vmatprep.subr.bf16.mxu1 %v2928_v17 }
 0x148   :  { %v518_v23 = vadd.f32 %v517_v21, %v516_v19  ;;  %v542_v24 = vrot.slane %v541_v20, 4  ;;  %2662 = vmatpush3.bf16.msra.mxu1 %v2928_v17 }
 0x14a   :  { %v519_v25 = vrot.slane %v518_v23, 2  ;;  %v543_v26 = vadd.f32 %v542_v24, %v541_v20  ;;  %v2929_v20 = vld [vmem:[%s3840_s4 + $0x18] sm:$0xff]   ;;  %v2932_v24 = vld [vmem:[%s3840_s4 + $0x30] sm:$0xff]  }
 0x14b   :  { %2663 = vmatprep.subr.bf16.mxu1 %v2929_v20 }
 0x14c   :  { %v520_v28 = vadd.f32 %v519_v25, %v518_v23  ;;  %v544_v30 = vrot.slane %v543_v26, 2  ;;  %2664 = vmatpush3.bf16.msra.mxu1 %v2929_v20  ;;  %v2931_v23 = vld [vmem:[%s3840_s4 + $0x28] sm:$0xff]   ;;  %v2933_v25 = vld [vmem:[%s3840_s4 + $0x38] sm:$0xff]  }
 0x14d   :  { %2665 = vmatprep.subr.bf16.mxu1 %v2930_v22 }
 0x14e   :  { %v521_v31 = vrot.slane %v520_v28, 1  ;;  %v545_v33 = vadd.f32 %v544_v30, %v543_v26  ;;  %v3363_v26 = vld [vmem:[%s3840_s4 + $0x40] sm:$0xff]  }
 0x150   :  { %v522_v34 = vadd.f32 %v521_v31, %v520_v28  ;;  %v546_v35 = vrot.slane %v545_v33, 1  ;;  %2666 = vmatpush3.bf16.msra.mxu1 %v2930_v22 }
 0x151   :  { %2667 = vmatprep.subr.bf16.mxu1 %v2931_v23 }
 0x152   :  { %523 = vrot.lane.b32.xlu0 %v522_v34, %s3009_s18  ;;  %v547_v36 = vadd.f32 %v546_v35, %v545_v33 }
 0x154   :  { %2668 = vmatpush3.bf16.msra.mxu1 %v2931_v23  ;;  %v2935_v23 = vld [vmem:[%s3840_s4 + $0x48] sm:$0xff]  }
 0x155   :  { %2669 = vmatprep.subr.bf16.mxu1 %v2932_v24 }
 0x156   :  { %548 = vrot.lane.b32.xlu0 %v547_v36, %s3009_s18 }
 0x158   :  { %2670 = vmatpush3.bf16.msra.mxu1 %v2932_v24 }
 0x159   :  { %2671 = vmatprep.subr.bf16.mxu1 %v2933_v25 }
 0x15c   :  { %v3310_v41 = vpop.f32.mrb[4].mxu0  ;;  %2672 = vmatpush3.bf16.msra.mxu1 %v2933_v25 }
 0x15d   :  { %v3312_v42 = vpop.f32.mrb[5].mxu0  ;;  %v1183_v46 = vmul.f32 %v3310_v41, %v3310_v41  ;;  %2677 = vmatprep.subr.bf16.mxu1 %v3363_v26 }
 0x15e   :  { %v1181_v43 = vmul.f32 %v3312_v42, %v3312_v42  ;;  %v3316_v44 = vpop.f32.mrb[6].mxu0 }
 0x15f   :  { %v3318_v45 = vpop.f32.mrb[7].mxu0  ;;  %v1184_v49 = vmul.f32 %v3316_v44, %v3316_v44 }
 0x160   :  { %v1160_v47 = vadd.f32 %v3318_v45, %v3312_v42  ;;  %v1182_v48 = vmul.f32 %v3318_v45, %v3318_v45 }
 0x162   :  { %v1161_v50 = vadd.f32 %v3310_v41, %v1160_v47  ;;  %v1185_v51 = vadd.f32 %v1182_v48, %v1181_v43  ;;  %v3378_v47 = vsub.s32 0, %v3104_v3  ;;  %v2986_v3 = vld [vmem:[%s3848_s13 + $0x60] sm:$0xff]  }
 0x164   :  { %v1162_v53 = vadd.f32 %v3316_v44, %v1161_v50  ;;  %v1186_v54 = vadd.f32 %v1185_v51, %v1183_v46  ;;  %v512_v46 = vld [vmem:[%s3841_s2] sm:$0x1] }
 0x165   :  { %v513_v50 = vld [vmem:[%s3842_s3] sm:$0x1] }
 0x166   :  { %v1187_v55 = vadd.f32 %v1186_v54, %v1184_v49  ;;  %v1163_v60 = vrot.slane %v1162_v53, 4 }
 0x168   :  { %v1164_v61 = vadd.f32 %v1163_v60, %v1162_v53  ;;  %v1188_v62 = vrot.slane %v1187_v55, 4 }
 0x16a   :  { %v1165_v63 = vrot.slane %v1164_v61, 2  ;;  %v1189_v0 = vadd.f32 %v1188_v62, %v1187_v55 }
 0x16c   :  { %v1166_v1 = vadd.f32 %v1165_v63, %v1164_v61  ;;  %v1190_v2 = vrot.slane %v1189_v0, 2 }
 0x16e   :  { %v1167_v10 = vrot.slane %v1166_v1, 1  ;;  %v1191_v11 = vadd.f32 %v1190_v2, %v1189_v0 }
 0x170   :  { %v1192_v16 = vrot.slane %v1191_v11, 1  ;;  %v1168_v19 = vadd.f32 %v1167_v10, %v1166_v1 }
 0x172   :  { %v1193_v21 = vadd.f32 %v1192_v16, %v1191_v11 }
 0x1c4   :  { %v524_v37 = vpop.permute.xlu0 %523 }
 0x1c5   :  { %v525_v38 = vadd.f32 %v524_v37, %v522_v34 }
 0x1c7   :  { %526 = vrot.lane.b32.xlu1 %v525_v38, %s3010_s19 }
 0x1c8   :  { %v549_v39 = vpop.permute.xlu0 %548 }
 0x1c9   :  { %v550_v40 = vadd.f32 %v549_v39, %v547_v36 }
 0x1cb   :  { %551 = vrot.lane.b32.xlu1 %v550_v40, %s3010_s19 }
 0x239   :  { %v527_v56 = vpop.permute.xlu1 %526 }
 0x23a   :  { %v528_v57 = vadd.f32 %v527_v56, %v525_v38 }
 0x23c   :  { %529 = vrot.lane.b32.xlu0 %v528_v57, %s3011_s7 }
 0x23d   :  { %v552_v58 = vpop.permute.xlu1 %551 }
 0x23e   :  { %v553_v59 = vadd.f32 %v552_v58, %v550_v40 }
 0x240   :  { %554 = vrot.lane.b32.xlu1 %v553_v59, %s3011_s7 }
 0x2ae   :  { %v530_v5 = vpop.permute.xlu0 %529 }
 0x2af   :  { %v531_v13 = vadd.f32 %v530_v5, %v528_v57 }
 0x2b1   :  { %532 = vrot.lane.b32.xlu0 %v531_v13, %s3012_s24 }
 0x2b2   :  { %v555_v14 = vpop.permute.xlu1 %554 }
 0x2b3   :  { %v556_v18 = vadd.f32 %v555_v14, %v553_v59 }
 0x2b5   :  { %557 = vrot.lane.b32.xlu1 %v556_v18, %s3012_s24 }
 0x2b9   :  { %1169 = vrot.lane.b32.xlu1 %v1168_v19, %s3009_s18 }
 0x2bd   :  { %1194 = vrot.lane.b32.xlu1 %v1193_v21, %s3009_s18 }
 0x323   :  { %v533_v27 = vpop.permute.xlu0 %532 }
 0x324   :  { %v534_v28 = vadd.f32 %v533_v27, %v531_v13 }
 0x326   :  { %v560_v30 = vmul.f32 0.001953125, %v534_v28 }
 0x327   :  { %v558_v31 = vpop.permute.xlu1 %557 }
 0x328   :  { %v559_v33 = vadd.f32 %v558_v31, %v556_v18  ;;  %v562_v34 = vmul.f32 %v560_v30, %v560_v30  ;;  %v2936_v31 = vld [vmem:[%s3840_s4 + $0x50] sm:$0xff]  }
 0x32a   :  { %v561_v35 = vmul.f32 0.001953125, %v559_v33  ;;  %v2937_v33 = vld [vmem:[%s3840_s4 + $0x58] sm:$0xff]  }
 0x32b   :  { %v1170_v36 = vpop.permute.xlu1 %1169 }
 0x32c   :  { %v563_v37 = vsub.f32 %v561_v35, %v562_v34  ;;  %v3366_v38 = vadd.f32 %v1170_v36, %v1168_v19  ;;  %v2938_v34 = vld [vmem:[%s3840_s4 + $0x60] sm:$0xff]   ;;  %v2940_v35 = vld [vmem:[%s3840_s4 + $0x70] sm:$0xff]   ;;  %v2941_v36 = vld [vmem:[%s3840_s4 + $0x78] sm:$0xff]  }
 0x32e   :  { %v564_v39 = vadd.f32 1e-05, %v563_v37  ;;  %1172 = vrot.lane.b32.xlu1 %v3366_v38, %s3010_s19  ;;  %v2942_v37 = vld [vmem:[%s3840_s4 + $0x80] sm:$0xff]  }
 0x32f   :  { %v1195_v40 = vpop.permute.xlu1 %1194 }
 0x330   :  { %2998 = vrsqrt.f32 %v564_v39  ;;  %v3370_v43 = vadd.f32 %v1195_v40, %v1193_v21  ;;  %v2943_v39 = vld [vmem:[%s3840_s4 + $0x88] sm:$0xff]   ;;  %v2944_v40 = vld [vmem:[%s3840_s4 + $0x90] sm:$0xff]  }
 0x332   :  { %1197 = vrot.lane.b32.xlu1 %v3370_v43, %s3010_s19 }
 0x33a   :  { %v2999_v48 = vpop.eup %2998 }
 0x33b   :  { %v566_v49 = vmul.f32 %v2999_v48, %v512_v46  ;;  %v2945_v46 = vld [vmem:[%s3840_s4 + $0x98] sm:$0xff]   ;;  %v2946_v48 = vld [vmem:[%s3840_s4 + $0xa0] sm:$0xff]  }
 0x33d   :  { %v571_v51 = vrot.slane %v566_v49, %v3378_v47  ;;  %v577_v53 = vmul.f32 %v566_v49, %v560_v30  ;;  %v2947_v49 = vld [vmem:[%s3840_s4 + $0xa8] sm:$0xff]  }
 0x33f   :  { %v578_v54 = vsub.f32 %v513_v50, %v577_v53  ;;  %v573_v55 = vmul.f32 %v571_v51, %v3281_v7  ;;  %v574_v56 = vmul.f32 %v571_v51, %v3285_v9  ;;  %v576_v57 = vmul.f32 %v3283_v8, %v571_v51  ;;  %v2948_v50 = vld [vmem:[%s3840_s4 + $0xb0] sm:$0xff]  }
 0x340   :  { %v575_v59 = vmul.f32 %v3279_v6, %v571_v51  ;;  %v2949_v51 = vld [vmem:[%s3840_s4 + $0xb8] sm:$0xff]  }
 0x341   :  { %v583_v58 = vrot.slane %v578_v54, %v3378_v47 }
 0x343   :  { %v585_v60 = vadd.f32 %v583_v58, %v573_v55  ;;  %v586_v61 = vadd.f32 %v583_v58, %v574_v56  ;;  %v588_v62 = vadd.f32 %v583_v58, %v576_v57  ;;  %v587_v63 = vadd.f32 %v583_v58, %v575_v59 }
 0x345   :  { %v589_v0 = vmax.f32 %v585_v60, 0.0  ;;  %v590_v1 = vmax.f32 %v586_v61, 0.0  ;;  %v592_v2 = vmax.f32 %v588_v62, 0.0  ;;  %v591_v4 = vmax.f32 %v587_v63, 0.0 }
 0x347   :  { %v595_v5 = vrot.slane %v589_v0, 7  ;;  %v596_v10 = vrot.slane %v590_v1, 7  ;;  %v598_v11 = vrot.slane %v592_v2, 7  ;;  %v610_v7 = vrot.slane %v592_v2, 1 }
 0x348   :  { %v597_v12 = vrot.slane %v591_v4, 7  ;;  %v593_v9 = vpack.c.bf16 %v590_v1, %v589_v0  ;;  %v594_v13 = vpack.c.bf16 %v592_v2, %v591_v4  ;;  %v607_v8 = vrot.slane %v589_v0, 1 }
 0x349   :  { %v601_v14 = vsel %vm141_vm0, %v595_v5, %v596_v10  ;;  %v602_v6 = vsel %vm141_vm0, %v598_v11, %v595_v5  ;;  %v608_v16 = vrot.slane %v590_v1, 1  ;;  %v609_v17 = vrot.slane %v591_v4, 1 }
 0x34a   :  { %v2265_v18 = vpack.c.bf16 %v601_v14, %v602_v6  ;;  %v599_v19 = vsel %vm141_vm0, %v597_v12, %v598_v11  ;;  %v600_v20 = vsel %vm141_vm0, %v596_v10, %v597_v12  ;;  %v614_v21 = vsel %vm154_vm8, %v610_v7, %v607_v8 }
 0x34b   :  { %v2269_v22 = vpack.c.bf16 %v599_v19, %v600_v20  ;;  %v612_v24 = vsel %vm154_vm8, %v608_v16, %v609_v17  ;;  %v613_v25 = vsel %vm154_vm8, %v607_v8, %v608_v16  ;;  %v611_v27 = vsel %vm154_vm8, %v609_v17, %v610_v7 }
 0x34c   :  { %2673 = vmatprep.mubr.msk.bf16.mxu1 %vm3137_vm3, %v2265_v18  ;;  %v2305_v28 = vpack.c.bf16 %v612_v24, %v613_v25  ;;  %v2309_v30 = vpack.c.bf16 %v614_v21, %v611_v27 }
 0x34d   :  { %2674 = vmatmul.mubr.msk.bf16.vlgmr.msra.gmra.mrb[0].mxu1 %vm3176_vm7, %v2269_v22 }
 0x34e   :  { %2678 = vmatpush3.bf16.msra.mxu1 %v3363_v26  ;;  %2693 = vmatprep.mubr.bf16.mxu1 %v593_v9  ;;  %v2939_v26 = vld [vmem:[%s3840_s4 + $0x68] sm:$0xff]  }
 0x34f   :  { %2679 = vmatprep.subr.bf16.mxu1 %v2935_v23 }
 0x352   :  { %2680 = vmatpush3.bf16.msra.mxu1 %v2935_v23 }
 0x353   :  { %2681 = vmatprep.subr.bf16.mxu1 %v2936_v31 }
 0x356   :  { %2682 = vmatpush3.bf16.msra.mxu1 %v2936_v31 }
 0x357   :  { %2683 = vmatprep.subr.bf16.mxu1 %v2937_v33 }
 0x35a   :  { %2684 = vmatpush3.bf16.msra.mxu1 %v2937_v33 }
 0x35b   :  { %2685 = vmatprep.subr.bf16.mxu1 %v2938_v34 }
 0x35e   :  { %2686 = vmatpush3.bf16.msra.mxu1 %v2938_v34  ;;  %v2950_v34 = vld [vmem:[%s3843_s10] sm:$0xff]  }
 0x35f   :  { %2687 = vmatprep.subr.bf16.mxu1 %v2939_v26 }
 0x362   :  { %2688 = vmatpush3.bf16.msra.mxu1 %v2939_v26 }
 0x363   :  { %2689 = vmatprep.subr.bf16.mxu1 %v2940_v35 }
 0x366   :  { %2690 = vmatpush3.bf16.msra.mxu1 %v2940_v35 }
 0x367   :  { %2691 = vmatprep.subr.bf16.mxu1 %v2941_v36 }
 0x36a   :  { %2692 = vmatpush3.bf16.msra.mxu1 %v2941_v36  ;;  %v2951_v36 = vld [vmem:[%s3843_s10 + $0x8] sm:$0xff]  }
 0x36b   :  { %2697 = vmatprep.subr.bf16.mxu1 %v2942_v37 }
 0x36d   :  { %2694 = vmatmul.mubr.bf16.vlgmr.msra.gmra.mrb[0].mxu1 %v594_v13 }
 0x36e   :  { %2698 = vmatpush3.bf16.msra.mxu1 %v2942_v37  ;;  %2713 = vmatprep.mubr.msk.bf16.mxu1 %vm3228_vm10, %v2305_v28 }
 0x36f   :  { %2699 = vmatprep.subr.bf16.mxu1 %v2943_v39 }
 0x372   :  { %2700 = vmatpush3.bf16.msra.mxu1 %v2943_v39 }
 0x373   :  { %2701 = vmatprep.subr.bf16.mxu1 %v2944_v40 }
 0x376   :  { %2702 = vmatpush3.bf16.msra.mxu1 %v2944_v40  ;;  %v2952_v40 = vld [vmem:[%s3843_s10 + $0x10] sm:$0xff]  }
 0x377   :  { %2703 = vmatprep.subr.bf16.mxu1 %v2945_v46 }
 0x37a   :  { %2704 = vmatpush3.bf16.msra.mxu1 %v2945_v46  ;;  %v2953_v46 = vld [vmem:[%s3843_s10 + $0x18] sm:$0xff]  }
 0x37b   :  { %2705 = vmatprep.subr.bf16.mxu1 %v2946_v48 }
 0x37e   :  { %2706 = vmatpush3.bf16.msra.mxu1 %v2946_v48  ;;  %v2954_v48 = vld [vmem:[%s3843_s10 + $0x20] sm:$0xff]  }
 0x37f   :  { %2707 = vmatprep.subr.bf16.mxu1 %v2947_v49 }
 0x382   :  { %2708 = vmatpush3.bf16.msra.mxu1 %v2947_v49  ;;  %v2955_v49 = vld [vmem:[%s3843_s10 + $0x28] sm:$0xff]  }
 0x383   :  { %2709 = vmatprep.subr.bf16.mxu1 %v2948_v50 }
 0x386   :  { %2710 = vmatpush3.bf16.msra.mxu1 %v2948_v50  ;;  %v2956_v50 = vld [vmem:[%s3843_s10 + $0x30] sm:$0xff]  }
 0x387   :  { %2711 = vmatprep.subr.bf16.mxu1 %v2949_v51 }
 0x38a   :  { %2712 = vmatpush3.bf16.msra.mxu1 %v2949_v51  ;;  %v2957_v51 = vld [vmem:[%s3843_s10 + $0x38] sm:$0xff]  }
 0x38b   :  { %2737 = vmatprep.subr.bf16.mxu1 %v2950_v34 }
 0x38d   :  { %2714 = vmatmul.mubr.msk.bf16.vlgmr.msra.gmra.mrb[0].mxu1 %vm3168_vm5, %v2309_v30 }
 0x38e   :  { %2738 = vmatpush3.bf16.msra.mxu1 %v2950_v34 }
 0x38f   :  { %2739 = vmatprep.subr.bf16.mxu1 %v2951_v36 }
 0x392   :  { %2740 = vmatpush3.bf16.msra.mxu1 %v2951_v36 }
 0x393   :  { %2741 = vmatprep.subr.bf16.mxu1 %v2952_v40 }
 0x396   :  { %2742 = vmatpush3.bf16.msra.mxu1 %v2952_v40 }
 0x397   :  { %2743 = vmatprep.subr.bf16.mxu1 %v2953_v46 }
 0x39a   :  { %2744 = vmatpush3.bf16.msra.mxu1 %v2953_v46 }
 0x39b   :  { %2745 = vmatprep.subr.bf16.mxu1 %v2954_v48 }
 0x39e   :  { %2746 = vmatpush3.bf16.msra.mxu1 %v2954_v48 }
 0x39f   :  { %2747 = vmatprep.subr.bf16.mxu1 %v2955_v49 }
 0x3a0   :  { %v1173_v53 = vpop.permute.xlu1 %1172 }
 0x3a1   :  { %v1174_v54 = vadd.f32 %v1173_v53, %v3366_v38  ;;  %v3526_v53 = vld [vmem:[%s3843_s10 + $0x40] sm:$0xff]  }
 0x3a2   :  { %2748 = vmatpush3.bf16.msra.mxu1 %v2955_v49 }
 0x3a3   :  { %1175 = vrot.lane.b32.xlu1 %v1174_v54, %s3011_s7  ;;  %2749 = vmatprep.subr.bf16.mxu1 %v2956_v50 }
 0x3a4   :  { %v1198_v55 = vpop.permute.xlu1 %1197 }
 0x3a5   :  { %v1199_v56 = vadd.f32 %v1198_v55, %v3370_v43 }
 0x3a6   :  { %2750 = vmatpush3.bf16.msra.mxu1 %v2956_v50 }
 0x3a7   :  { %1200 = vrot.lane.b32.xlu1 %v1199_v56, %s3011_s7  ;;  %2751 = vmatprep.subr.bf16.mxu1 %v2957_v51 }
 0x3aa   :  { %2752 = vmatpush3.bf16.msra.mxu1 %v2957_v51 }
 0x3ab   :  { %2757 = vmatprep.subr.bf16.mxu1 %v3526_v53 }
 0x415   :  { %v1176_v57 = vpop.permute.xlu1 %1175 }
 0x416   :  { %v3463_v58 = vadd.f32 %v1176_v57, %v1174_v54 }
 0x418   :  { %1178 = vrot.lane.b32.xlu1 %v3463_v58, %s3012_s24 }
 0x419   :  { %v1201_v59 = vpop.permute.xlu1 %1200 }
 0x41a   :  { %v3467_v60 = vadd.f32 %v1201_v59, %v1199_v56 }
 0x41c   :  { %1203 = vrot.lane.b32.xlu1 %v3467_v60, %s3012_s24 }
 0x460   :  { %v3471_v38 = vpop.f32.mrb[0].mxu1 }
 0x461   :  { %v3473_v61 = vpop.f32.mrb[1].mxu1  ;;  %v993_v2 = vmul.f32 %v3471_v38, %v3471_v38 }
 0x462   :  { %v3475_v62 = vpop.f32.mrb[2].mxu1  ;;  %v991_v63 = vmul.f32 %v3473_v61, %v3473_v61 }
 0x463   :  { %v3477_v43 = vpop.f32.mrb[3].mxu1  ;;  %v994_v10 = vmul.f32 %v3475_v62, %v3475_v62 }
 0x464   :  { %v970_v0 = vadd.f32 %v3477_v43, %v3473_v61  ;;  %v992_v1 = vmul.f32 %v3477_v43, %v3477_v43 }
 0x466   :  { %v971_v4 = vadd.f32 %v3471_v38, %v970_v0  ;;  %v995_v5 = vadd.f32 %v992_v1, %v991_v63 }
 0x468   :  { %v972_v11 = vadd.f32 %v3475_v62, %v971_v4  ;;  %v996_v7 = vadd.f32 %v995_v5, %v993_v2 }
 0x46a   :  { %v973_v12 = vrot.slane %v972_v11, 4  ;;  %v997_v9 = vadd.f32 %v996_v7, %v994_v10 }
 0x46c   :  { %v974_v13 = vadd.f32 %v973_v12, %v972_v11  ;;  %v998_v8 = vrot.slane %v997_v9, 4 }
 0x46e   :  { %v975_v14 = vrot.slane %v974_v13, 2  ;;  %v999_v6 = vadd.f32 %v998_v8, %v997_v9 }
 0x470   :  { %v976_v16 = vadd.f32 %v975_v14, %v974_v13  ;;  %v1000_v17 = vrot.slane %v999_v6, 2 }
 0x472   :  { %v977_v18 = vrot.slane %v976_v16, 1  ;;  %v1001_v19 = vadd.f32 %v1000_v17, %v999_v6  ;;  %v968_v17 = vld [vmem:[%s3846_s5] sm:$0x1] }
 0x474   :  { %v978_v20 = vadd.f32 %v977_v18, %v976_v16  ;;  %v1002_v21 = vrot.slane %v1001_v19, 1  ;;  %v1159_v16 = vld [vmem:[%s3845_s9] sm:$0x1] }
 0x476   :  { %979 = vrot.lane.b32.xlu0 %v978_v20, %s3009_s18  ;;  %v1003_v22 = vadd.f32 %v1002_v21, %v1001_v19 }
 0x47a   :  { %1004 = vrot.lane.b32.xlu0 %v1003_v22, %s3009_s18 }
 0x48a   :  { %v1179_v54 = vpop.permute.xlu1 %1178 }
 0x48b   :  { %v1180_v56 = vadd.f32 %v1179_v54, %v3463_v58  ;;  %v1158_v58 = vld [vmem:[%s3844_s8] sm:$0x1] }
 0x48d   :  { %v1206_v59 = vmul.f32 0.001953125, %v1180_v56 }
 0x48e   :  { %v1204_v55 = vpop.permute.xlu1 %1203 }
 0x48f   :  { %v1205_v57 = vadd.f32 %v1204_v55, %v3467_v60  ;;  %v1208_v0 = vmul.f32 %v1206_v59, %v1206_v59 }
 0x491   :  { %v1207_v63 = vmul.f32 0.001953125, %v1205_v57 }
 0x493   :  { %v1209_v1 = vsub.f32 %v1207_v63, %v1208_v0 }
 0x495   :  { %v1210_v2 = vadd.f32 1e-05, %v1209_v1 }
 0x497   :  { %3000 = vrsqrt.f32 %v1210_v2 }
 0x4a1   :  { %v3001_v14 = vpop.eup %3000 }
 0x4a2   :  { %v1212_v60 = vmul.f32 %v3001_v14, %v1158_v58 }
 0x4a4   :  { %v1223_v6 = vmul.f32 %v1212_v60, %v1206_v59  ;;  %v1217_v21 = vrot.slane %v1212_v60, %v3378_v47 }
 0x4a6   :  { %v1224_v19 = vsub.f32 %v1159_v16, %v1223_v6  ;;  %v2966_v6 = vld [vmem:[%s3843_s10 + $0x80] sm:$0xff]  }
 0x4e8   :  { %v980_v23 = vpop.permute.xlu0 %979 }
 0x4e9   :  { %v981_v24 = vadd.f32 %v980_v23, %v978_v20 }
 0x4eb   :  { %982 = vrot.lane.b32.xlu0 %v981_v24, %s3010_s19 }
 0x4ec   :  { %v1005_v25 = vpop.permute.xlu0 %1004 }
 0x4ed   :  { %v1006_v27 = vadd.f32 %v1005_v25, %v1003_v22  ;;  %v969_v22 = vld [vmem:[%s3847_s6] sm:$0x1]  ;;  %v1229_v25 = vrot.slane %v1224_v19, %v3378_v47  ;;  %v2967_v19 = vld [vmem:[%s3843_s10 + $0x88] sm:$0xff]  }
 0x4ef   :  { %1007 = vrot.lane.b32.xlu0 %v1006_v27, %s3010_s19 }
 0x55d   :  { %v983_v28 = vpop.permute.xlu0 %982 }
 0x55e   :  { %v984_v30 = vadd.f32 %v983_v28, %v981_v24 }
 0x560   :  { %985 = vrot.lane.b32.xlu0 %v984_v30, %s3011_s7 }
 0x561   :  { %v1008_v31 = vpop.permute.xlu0 %1007 }
 0x562   :  { %v1009_v33 = vadd.f32 %v1008_v31, %v1006_v27  ;;  %v1219_v27 = vmul.f32 %v1217_v21, %v3312_v42  ;;  %v1221_v31 = vmul.f32 %v3310_v41, %v1217_v21 }
 0x564   :  { %1010 = vrot.lane.b32.xlu0 %v1009_v33, %s3011_s7  ;;  %v1231_v40 = vadd.f32 %v1229_v25, %v1219_v27  ;;  %v2973_v27 = vld [vmem:[%s3843_s10 + $0xb8] sm:$0xff]  }
 0x5d2   :  { %v986_v26 = vpop.permute.xlu0 %985 }
 0x5d3   :  { %v987_v35 = vadd.f32 %v986_v26, %v984_v30  ;;  %v1220_v30 = vmul.f32 %v1217_v21, %v3318_v45 }
 0x5d5   :  { %988 = vrot.lane.b32.xlu0 %v987_v35, %s3012_s24  ;;  %v1232_v42 = vadd.f32 %v1229_v25, %v1220_v30 }
 0x5d6   :  { %v1011_v37 = vpop.permute.xlu0 %1010 }
 0x5d7   :  { %v1012_v39 = vadd.f32 %v1011_v37, %v1009_v33  ;;  %v1222_v33 = vmul.f32 %v3316_v44, %v1217_v21  ;;  %v2968_v21 = vld [vmem:[%s3843_s10 + $0x90] sm:$0xff]  }
 0x5d9   :  { %1013 = vrot.lane.b32.xlu0 %v1012_v39, %s3012_s24  ;;  %v1234_v46 = vadd.f32 %v1229_v25, %v1222_v33 }
 0x647   :  { %v989_v4 = vpop.permute.xlu0 %988 }
 0x648   :  { %v990_v5 = vadd.f32 %v989_v4, %v987_v35 }
 0x64a   :  { %v1016_v10 = vmul.f32 0.001953125, %v990_v5 }
 0x64b   :  { %v1014_v11 = vpop.permute.xlu0 %1013 }
 0x64c   :  { %v1015_v7 = vadd.f32 %v1014_v11, %v1012_v39  ;;  %v1018_v12 = vmul.f32 %v1016_v10, %v1016_v10  ;;  %v1233_v39 = vadd.f32 %v1229_v25, %v1221_v31  ;;  %v2972_v25 = vld [vmem:[%s3843_s10 + $0xb0] sm:$0xff]  }
 0x64e   :  { %v1017_v9 = vmul.f32 0.001953125, %v1015_v7  ;;  %v2960_v7 = vld [vmem:[%s3843_s10 + $0x50] sm:$0xff]  }
 0x650   :  { %v1019_v13 = vsub.f32 %v1017_v9, %v1018_v12  ;;  %v2961_v12 = vld [vmem:[%s3843_s10 + $0x58] sm:$0xff]   ;;  %v2962_v9 = vld [vmem:[%s3843_s10 + $0x60] sm:$0xff]  }
 0x652   :  { %v1020_v8 = vadd.f32 1e-05, %v1019_v13  ;;  %v2964_v13 = vld [vmem:[%s3843_s10 + $0x70] sm:$0xff]  }
 0x654   :  { %3002 = vrsqrt.f32 %v1020_v8  ;;  %v2965_v8 = vld [vmem:[%s3843_s10 + $0x78] sm:$0xff]  }
 0x65e   :  { %v3003_v18 = vpop.eup %3002 }
 0x65f   :  { %v1022_v20 = vmul.f32 %v3003_v18, %v968_v17 }
 0x661   :  { %v1027_v23 = vrot.slane %v1022_v20, %v3378_v47  ;;  %v1033_v24 = vmul.f32 %v1022_v20, %v1016_v10  ;;  %v2959_v10 = vld [vmem:[%s3843_s10 + $0x48] sm:$0xff]  }
 0x663   :  { %v1034_v28 = vsub.f32 %v969_v22, %v1033_v24  ;;  %v1029_v34 = vmul.f32 %v1027_v23, %v3473_v61  ;;  %v1030_v26 = vmul.f32 %v1027_v23, %v3477_v43  ;;  %v1031_v35 = vmul.f32 %v3471_v38, %v1027_v23  ;;  %v2969_v22 = vld [vmem:[%s3843_s10 + $0x98] sm:$0xff]   ;;  %v2971_v24 = vld [vmem:[%s3843_s10 + $0xa8] sm:$0xff]  }
 0x664   :  { %v1032_v36 = vmul.f32 %v3475_v62, %v1027_v23  ;;  %v2970_v23 = vld [vmem:[%s3843_s10 + $0xa0] sm:$0xff]  }
 0x665   :  { %v1039_v37 = vrot.slane %v1034_v28, %v3378_v47 }
 0x667   :  { %v1043_v48 = vadd.f32 %v1039_v37, %v1031_v35  ;;  %v1041_v45 = vadd.f32 %v1039_v37, %v1029_v34  ;;  %v1042_v49 = vadd.f32 %v1039_v37, %v1030_v26  ;;  %v1044_v41 = vadd.f32 %v1039_v37, %v1032_v36 }
 0x669   :  { %v1235_v50 = vadd.f32 %v1231_v40, %v1041_v45  ;;  %v1236_v44 = vadd.f32 %v1232_v42, %v1042_v49  ;;  %v1238_v51 = vadd.f32 %v1234_v46, %v1044_v41  ;;  %v1237_v61 = vadd.f32 %v1233_v39, %v1043_v48 }
 0x66b   :  { %v3555_v54 = vmax.f32 %v1235_v50, 0.0  ;;  %v3557_v43 = vmax.f32 %v1236_v44, 0.0  ;;  %v3559_v38 = vmax.f32 %v1238_v51, 0.0  ;;  %v3561_v62 = vmax.f32 %v1237_v61, 0.0 }
 0x66d   :  { %v1245_v55 = vrot.slane %v3555_v54, 7  ;;  %v1246_v56 = vrot.slane %v3557_v43, 7  ;;  %v1248_v57 = vrot.slane %v3559_v38, 7  ;;  %v1247_v59 = vrot.slane %v3561_v62, 7 }
 0x66e   :  { %v1243_v11 = vpack.c.bf16 %v3557_v43, %v3555_v54  ;;  %v1257_v14 = vrot.slane %v3555_v54, 1  ;;  %v1258_v58 = vrot.slane %v3557_v43, 1  ;;  %v1259_v60 = vrot.slane %v3561_v62, 1 }
 0x66f   :  { %v1251_v63 = vsel %vm141_vm0, %v1245_v55, %v1246_v56  ;;  %v1252_v0 = vsel %vm141_vm0, %v1248_v57, %v1245_v55  ;;  %v1249_v1 = vsel %vm141_vm0, %v1247_v59, %v1248_v57  ;;  %v1250_v2 = vsel %vm141_vm0, %v1246_v56, %v1247_v59 }
 0x670   :  { %v2345_v4 = vpack.c.bf16 %v1251_v63, %v1252_v0  ;;  %v2349_v5 = vpack.c.bf16 %v1249_v1, %v1250_v2  ;;  %v1262_v16 = vsel %vm154_vm8, %v1258_v58, %v1259_v60  ;;  %v1263_v17 = vsel %vm154_vm8, %v1257_v14, %v1258_v58 }
 0x671   :  { %v1244_v18 = vpack.c.bf16 %v3559_v38, %v3561_v62  ;;  %v2385_v20 = vpack.c.bf16 %v1262_v16, %v1263_v17  ;;  %v1260_v28 = vrot.slane %v3559_v38, 1  ;;  %v2976_v17 = vld [vmem:[%s3848_s13 + $0x10] sm:$0xff]  }
 0x672   :  { %2753 = vmatprep.mubr.msk.bf16.mxu1 %vm3137_vm3, %v2345_v4 }
 0x673   :  { %2754 = vmatmul.mubr.msk.bf16.vlgmr.msra.gmra.mrb[4].mxu1 %vm3176_vm7, %v2349_v5  ;;  %v1261_v30 = vsel %vm154_vm8, %v1259_v60, %v1260_v28  ;;  %v1264_v31 = vsel %vm154_vm8, %v1260_v28, %v1257_v14  ;;  %v2975_v60 = vld [vmem:[%s3848_s13 + $0x8] sm:$0xff]  }
 0x674   :  { %2758 = vmatpush3.bf16.msra.mxu1 %v3526_v53  ;;  %2773 = vmatprep.mubr.bf16.mxu1 %v1243_v11  ;;  %v2963_v53 = vld [vmem:[%s3843_s10 + $0x68] sm:$0xff]   ;;  %v2389_v33 = vpack.c.bf16 %v1264_v31, %v1261_v30 }
 0x675   :  { %2759 = vmatprep.subr.bf16.mxu1 %v2959_v10 }
 0x678   :  { %2760 = vmatpush3.bf16.msra.mxu1 %v2959_v10 }
 0x679   :  { %2761 = vmatprep.subr.bf16.mxu1 %v2960_v7 }
 0x67c   :  { %2762 = vmatpush3.bf16.msra.mxu1 %v2960_v7 }
 0x67d   :  { %2763 = vmatprep.subr.bf16.mxu1 %v2961_v12 }
 0x680   :  { %2764 = vmatpush3.bf16.msra.mxu1 %v2961_v12 }
 0x681   :  { %2765 = vmatprep.subr.bf16.mxu1 %v2962_v9 }
 0x684   :  { %2766 = vmatpush3.bf16.msra.mxu1 %v2962_v9 }
 0x685   :  { %2767 = vmatprep.subr.bf16.mxu1 %v2963_v53 }
 0x688   :  { %2768 = vmatpush3.bf16.msra.mxu1 %v2963_v53 }
 0x689   :  { %2769 = vmatprep.subr.bf16.mxu1 %v2964_v13 }
 0x68c   :  { %2770 = vmatpush3.bf16.msra.mxu1 %v2964_v13 }
 0x68d   :  { %2771 = vmatprep.subr.bf16.mxu1 %v2965_v8 }
 0x690   :  { %2772 = vmatpush3.bf16.msra.mxu1 %v2965_v8  ;;  %v2974_v8 = vld [vmem:[%s3848_s13] sm:$0xff]  }
 0x691   :  { %2777 = vmatprep.subr.bf16.mxu1 %v2966_v6  ;;  %2797 = vmatprep.subr.bf16.mxu0 %v2974_v8 }
 0x692   :  { %2798 = vmatpush3.bf16.msra.mxu0 %v2974_v8 }
 0x693   :  { %2774 = vmatmul.mubr.bf16.vlgmr.msra.gmra.mrb[4].mxu1 %v1244_v18  ;;  %2799 = vmatprep.subr.bf16.mxu0 %v2975_v60  ;;  %v2977_v18 = vld [vmem:[%s3848_s13 + $0x18] sm:$0xff]  }
 0x694   :  { %2778 = vmatpush3.bf16.msra.mxu1 %v2966_v6  ;;  %2793 = vmatprep.mubr.msk.bf16.mxu1 %vm3228_vm10, %v2385_v20  ;;  %v2979_v20 = vld [vmem:[%s3848_s13 + $0x28] sm:$0xff]  }
 0x695   :  { %2779 = vmatprep.subr.bf16.mxu1 %v2967_v19 }
 0x696   :  { %2800 = vmatpush3.bf16.msra.mxu0 %v2975_v60 }
 0x697   :  { %2801 = vmatprep.subr.bf16.mxu0 %v2976_v17 }
 0x698   :  { %2780 = vmatpush3.bf16.msra.mxu1 %v2967_v19  ;;  %v2978_v19 = vld [vmem:[%s3848_s13 + $0x20] sm:$0xff]  }
 0x699   :  { %2781 = vmatprep.subr.bf16.mxu1 %v2968_v21 }
 0x69a   :  { %2802 = vmatpush3.bf16.msra.mxu0 %v2976_v17 }
 0x69b   :  { %2803 = vmatprep.subr.bf16.mxu0 %v2977_v18 }
 0x69c   :  { %2782 = vmatpush3.bf16.msra.mxu1 %v2968_v21  ;;  %v2980_v21 = vld [vmem:[%s3848_s13 + $0x30] sm:$0xff]  }
 0x69d   :  { %2783 = vmatprep.subr.bf16.mxu1 %v2969_v22 }
 0x69e   :  { %2804 = vmatpush3.bf16.msra.mxu0 %v2977_v18 }
 0x69f   :  { %2805 = vmatprep.subr.bf16.mxu0 %v2978_v19 }
 0x6a0   :  { %2784 = vmatpush3.bf16.msra.mxu1 %v2969_v22  ;;  %v2981_v22 = vld [vmem:[%s3848_s13 + $0x38] sm:$0xff]  }
 0x6a1   :  { %2785 = vmatprep.subr.bf16.mxu1 %v2970_v23 }
 0x6a2   :  { %2806 = vmatpush3.bf16.msra.mxu0 %v2978_v19 }
 0x6a3   :  { %2807 = vmatprep.subr.bf16.mxu0 %v2979_v20 }
 0x6a4   :  { %2786 = vmatpush3.bf16.msra.mxu1 %v2970_v23  ;;  %v2982_v23 = vld [vmem:[%s3848_s13 + $0x40] sm:$0xff]  }
 0x6a5   :  { %2787 = vmatprep.subr.bf16.mxu1 %v2971_v24 }
 0x6a6   :  { %2808 = vmatpush3.bf16.msra.mxu0 %v2979_v20 }
 0x6a7   :  { %2809 = vmatprep.subr.bf16.mxu0 %v2980_v21 }
 0x6a8   :  { %2788 = vmatpush3.bf16.msra.mxu1 %v2971_v24 }
 0x6a9   :  { %2789 = vmatprep.subr.bf16.mxu1 %v2972_v25 }
 0x6aa   :  { %2810 = vmatpush3.bf16.msra.mxu0 %v2980_v21 }
 0x6ab   :  { %2811 = vmatprep.subr.bf16.mxu0 %v2981_v22 }
 0x6ac   :  { %2790 = vmatpush3.bf16.msra.mxu1 %v2972_v25 }
 0x6ad   :  { %2791 = vmatprep.subr.bf16.mxu1 %v2973_v27 }
 0x6ae   :  { %2812 = vmatpush3.bf16.msra.mxu0 %v2981_v22  ;;  %v2987_v22 = vld [vmem:[%s3848_s13 + $0x68] sm:$0xff]  }
 0x6af   :  { %2817 = vmatprep.subr.bf16.mxu0 %v2982_v23 }
 0x6b0   :  { %2792 = vmatpush3.bf16.msra.mxu1 %v2973_v27 }
 0x6b3   :  { %2794 = vmatmul.mubr.msk.bf16.vlgmr.msra.gmra.mrb[4].mxu1 %vm3168_vm5, %v2389_v33 }
 0x786   :  { %v3645_v34 = vpop.f32.mrb[4].mxu1 }
 0x787   :  { %v3647_v26 = vpop.f32.mrb[5].mxu1  ;;  %v1643_v42 = vmul.f32 %v3645_v34, %v3645_v34 }
 0x788   :  { %v3649_v35 = vpop.f32.mrb[6].mxu1  ;;  %v1641_v37 = vmul.f32 %v3647_v26, %v3647_v26 }
 0x789   :  { %v3651_v36 = vpop.f32.mrb[7].mxu1  ;;  %v1644_v45 = vmul.f32 %v3649_v35, %v3649_v35 }
 0x78a   :  { %v1620_v39 = vadd.f32 %v3651_v36, %v3647_v26  ;;  %v1642_v40 = vmul.f32 %v3651_v36, %v3651_v36 }
 0x78c   :  { %v1621_v46 = vadd.f32 %v3645_v34, %v1620_v39  ;;  %v1645_v48 = vadd.f32 %v1642_v40, %v1641_v37  ;;  %v1618_v40 = vld [vmem:[%s3849_s11] sm:$0x1] }
 0x78e   :  { %v1622_v49 = vadd.f32 %v3649_v35, %v1621_v46  ;;  %v1646_v41 = vadd.f32 %v1645_v48, %v1643_v42  ;;  %v1619_v48 = vld [vmem:[%s3850_s12] sm:$0x1] }
 0x790   :  { %v1623_v50 = vrot.slane %v1622_v49, 4  ;;  %v1647_v44 = vadd.f32 %v1646_v41, %v1644_v45 }
 0x792   :  { %v1624_v51 = vadd.f32 %v1623_v50, %v1622_v49  ;;  %v1648_v61 = vrot.slane %v1647_v44, 4 }
 0x794   :  { %v1625_v55 = vrot.slane %v1624_v51, 2  ;;  %v1649_v56 = vadd.f32 %v1648_v61, %v1647_v44 }
 0x796   :  { %v1626_v57 = vadd.f32 %v1625_v55, %v1624_v51  ;;  %v1650_v59 = vrot.slane %v1649_v56, 2 }
 0x798   :  { %v1627_v63 = vrot.slane %v1626_v57, 1  ;;  %v1651_v0 = vadd.f32 %v1650_v59, %v1649_v56 }
 0x79a   :  { %v1628_v1 = vadd.f32 %v1627_v63, %v1626_v57  ;;  %v1652_v2 = vrot.slane %v1651_v0, 1 }
 0x79c   :  { %1629 = vrot.lane.b32.xlu0 %v1628_v1, %s3009_s18  ;;  %v1653_v4 = vadd.f32 %v1652_v2, %v1651_v0 }
 0x79e   :  { %1654 = vrot.lane.b32.xlu1 %v1653_v4, %s3009_s18 }
 0x80e   :  { %v1630_v5 = vpop.permute.xlu0 %1629 }
 0x80f   :  { %v1631_v10 = vadd.f32 %v1630_v5, %v1628_v1 }
 0x810   :  { %v1655_v11 = vpop.permute.xlu1 %1654 }
 0x811   :  { %v1656_v7 = vadd.f32 %v1655_v11, %v1653_v4  ;;  %1632 = vrot.lane.b32.xlu0 %v1631_v10, %s3010_s19 }
 0x813   :  { %1657 = vrot.lane.b32.xlu1 %v1656_v7, %s3010_s19 }
 0x883   :  { %v1633_v12 = vpop.permute.xlu0 %1632 }
 0x884   :  { %v1634_v9 = vadd.f32 %v1633_v12, %v1631_v10 }
 0x885   :  { %v1658_v53 = vpop.permute.xlu1 %1657 }
 0x886   :  { %v1659_v13 = vadd.f32 %v1658_v53, %v1656_v7  ;;  %1635 = vrot.lane.b32.xlu0 %v1634_v9, %s3011_s7 }
 0x888   :  { %1660 = vrot.lane.b32.xlu1 %v1659_v13, %s3011_s7 }
 0x8f8   :  { %v1636_v14 = vpop.permute.xlu0 %1635 }
 0x8f9   :  { %v1637_v58 = vadd.f32 %v1636_v14, %v1634_v9 }
 0x8fa   :  { %v1661_v6 = vpop.permute.xlu1 %1660 }
 0x8fb   :  { %v1662_v16 = vadd.f32 %v1661_v6, %v1659_v13  ;;  %1638 = vrot.lane.b32.xlu0 %v1637_v58, %s3012_s24  ;;  %v2983_v6 = vld [vmem:[%s3848_s13 + $0x48] sm:$0xff]  }
 0x8fd   :  { %1663 = vrot.lane.b32.xlu1 %v1662_v16, %s3012_s24 }
 0x96d   :  { %v1639_v24 = vpop.permute.xlu0 %1638 }
 0x96e   :  { %v1640_v25 = vadd.f32 %v1639_v24, %v1637_v58  ;;  %v2989_v24 = vld [vmem:[%s3848_s13 + $0x78] sm:$0xff]  }
 0x96f   :  { %v1664_v27 = vpop.permute.xlu1 %1663 }
 0x970   :  { %v1666_v28 = vmul.f32 0.001953125, %v1640_v25  ;;  %v1665_v30 = vadd.f32 %v1664_v27, %v1662_v16  ;;  %v2990_v25 = vld [vmem:[%s3848_s13 + $0x80] sm:$0xff]   ;;  %v2991_v27 = vld [vmem:[%s3848_s13 + $0x88] sm:$0xff]  }
 0x972   :  { %v1668_v31 = vmul.f32 %v1666_v28, %v1666_v28  ;;  %v1667_v33 = vmul.f32 0.001953125, %v1665_v30  ;;  %v2993_v30 = vld [vmem:[%s3848_s13 + $0x98] sm:$0xff]  }
 0x974   :  { %v1669_v37 = vsub.f32 %v1667_v33, %v1668_v31  ;;  %v2994_v31 = vld [vmem:[%s3848_s13 + $0xa0] sm:$0xff]   ;;  %v2996_v33 = vld [vmem:[%s3848_s13 + $0xb0] sm:$0xff]  }
 0x976   :  { %v1670_v39 = vadd.f32 1e-05, %v1669_v37  ;;  %v2997_v37 = vld [vmem:[%s3848_s13 + $0xb8] sm:$0xff]  }
 0x978   :  { %3004 = vrsqrt.f32 %v1670_v39 }
 0x982   :  { %v3005_v42 = vpop.eup %3004 }
 0x983   :  { %v1672_v46 = vmul.f32 %v3005_v42, %v1618_v40 }
 0x985   :  { %v1677_v45 = vrot.slane %v1672_v46, %v3378_v47  ;;  %v1683_v49 = vmul.f32 %v1672_v46, %v1666_v28  ;;  %v2992_v28 = vld [vmem:[%s3848_s13 + $0x90] sm:$0xff]  }
 0x987   :  { %v1684_v41 = vsub.f32 %v1619_v48, %v1683_v49  ;;  %v1679_v50 = vmul.f32 %v1677_v45, %v3647_v26  ;;  %v1680_v51 = vmul.f32 %v1677_v45, %v3651_v36  ;;  %v1682_v61 = vmul.f32 %v3649_v35, %v1677_v45 }
 0x988   :  { %v1681_v55 = vmul.f32 %v3645_v34, %v1677_v45 }
 0x989   :  { %v1689_v44 = vrot.slane %v1684_v41, %v3378_v47 }
 0x98b   :  { %v1691_v56 = vadd.f32 %v1689_v44, %v1679_v50  ;;  %v1692_v57 = vadd.f32 %v1689_v44, %v1680_v51  ;;  %v1694_v59 = vadd.f32 %v1689_v44, %v1682_v61  ;;  %v1693_v63 = vadd.f32 %v1689_v44, %v1681_v55 }
 0x98d   :  { %v1695_v0 = vmax.f32 %v1691_v56, 0.0  ;;  %v1696_v1 = vmax.f32 %v1692_v57, 0.0  ;;  %v1698_v2 = vmax.f32 %v1694_v59, 0.0  ;;  %v1697_v4 = vmax.f32 %v1693_v63, 0.0 }
 0x98f   :  { %v1701_v5 = vrot.slane %v1695_v0, 7  ;;  %v1702_v10 = vrot.slane %v1696_v1, 7  ;;  %v1704_v11 = vrot.slane %v1698_v2, 7  ;;  %v1703_v26 = vrot.slane %v1697_v4, 7 }
 0x990   :  { %v1699_v7 = vpack.c.bf16 %v1696_v1, %v1695_v0  ;;  %v1700_v12 = vpack.c.bf16 %v1698_v2, %v1697_v4  ;;  %v1713_v9 = vrot.slane %v1695_v0, 1  ;;  %v1714_v36 = vrot.slane %v1696_v1, 1 }
 0x991   :  { %v1707_v35 = vsel %vm141_vm0, %v1701_v5, %v1702_v10  ;;  %v1708_v34 = vsel %vm141_vm0, %v1704_v11, %v1701_v5  ;;  %v1705_v53 = vsel %vm141_vm0, %v1703_v26, %v1704_v11  ;;  %v1706_v13 = vsel %vm141_vm0, %v1702_v10, %v1703_v26 }
 0x992   :  { %v2417_v8 = vpack.c.bf16 %v1707_v35, %v1708_v34  ;;  %v2421_v14 = vpack.c.bf16 %v1705_v53, %v1706_v13  ;;  %v1715_v58 = vrot.slane %v1697_v4, 1  ;;  %v1719_v60 = vsel %vm154_vm8, %v1713_v9, %v1714_v36 }
 0x993   :  { %v1716_v16 = vrot.slane %v1698_v2, 1 }
 0x994   :  { %2813 = vmatprep.mubr.msk.bf16.mxu0 %vm3137_vm3, %v2417_v8  ;;  %v1718_v17 = vsel %vm154_vm8, %v1714_v36, %v1715_v58 }
 0x995   :  { %2814 = vmatmul.mubr.msk.bf16.vlgmr.msra.gmra.mrb[8].mxu0 %vm3176_vm7, %v2421_v14  ;;  %v2457_v18 = vpack.c.bf16 %v1718_v17, %v1719_v60  ;;  %v1717_v19 = vsel %vm154_vm8, %v1715_v58, %v1716_v16  ;;  %v1720_v20 = vsel %vm154_vm8, %v1716_v16, %v1713_v9 }
 0x996   :  { %2818 = vmatpush3.bf16.msra.mxu0 %v2982_v23  ;;  %2833 = vmatprep.mubr.bf16.mxu0 %v1699_v7  ;;  %v2461_v21 = vpack.c.bf16 %v1720_v20, %v1717_v19  ;;  %v2988_v23 = vld [vmem:[%s3848_s13 + $0x70] sm:$0xff]  }
 0x997   :  { %2819 = vmatprep.subr.bf16.mxu0 %v2983_v6 }
 0x99a   :  { %2820 = vmatpush3.bf16.msra.mxu0 %v2983_v6 }
 0x99b   :  { %2821 = vmatprep.subr.bf16.mxu0 %v2984_v15 }
 0x99e   :  { %2822 = vmatpush3.bf16.msra.mxu0 %v2984_v15 }
 0x99f   :  { %2823 = vmatprep.subr.bf16.mxu0 %v2985_v32 }
 0x9a2   :  { %2824 = vmatpush3.bf16.msra.mxu0 %v2985_v32 }
 0x9a3   :  { %2825 = vmatprep.subr.bf16.mxu0 %v2986_v3 }
 0x9a6   :  { %2826 = vmatpush3.bf16.msra.mxu0 %v2986_v3  ;;  %v2074_v3 = vld [vmem:[%s3851_s14] sm:$0x1] }
 0x9a7   :  { %2827 = vmatprep.subr.bf16.mxu0 %v2987_v22 }
 0x9aa   :  { %2828 = vmatpush3.bf16.msra.mxu0 %v2987_v22 }
 0x9ab   :  { %2829 = vmatprep.subr.bf16.mxu0 %v2988_v23 }
 0x9ae   :  { %2830 = vmatpush3.bf16.msra.mxu0 %v2988_v23 }
 0x9af   :  { %2831 = vmatprep.subr.bf16.mxu0 %v2989_v24 }
 0x9b2   :  { %2832 = vmatpush3.bf16.msra.mxu0 %v2989_v24  ;;  %v2075_v24 = vld [vmem:[%s3852_s15] sm:$0x1] }
 0x9b3   :  { %2837 = vmatprep.subr.bf16.mxu0 %v2990_v25 }
 0x9b5   :  { %2834 = vmatmul.mubr.bf16.vlgmr.msra.gmra.mrb[8].mxu0 %v1700_v12 }
 0x9b6   :  { %2838 = vmatpush3.bf16.msra.mxu0 %v2990_v25  ;;  %2853 = vmatprep.mubr.msk.bf16.mxu0 %vm3228_vm10, %v2457_v18 }
 0x9b7   :  { %2839 = vmatprep.subr.bf16.mxu0 %v2991_v27 }
 0x9ba   :  { %2840 = vmatpush3.bf16.msra.mxu0 %v2991_v27 }
 0x9bb   :  { %2841 = vmatprep.subr.bf16.mxu0 %v2992_v28 }
 0x9be   :  { %2842 = vmatpush3.bf16.msra.mxu0 %v2992_v28 }
 0x9bf   :  { %2843 = vmatprep.subr.bf16.mxu0 %v2993_v30 }
 0x9c2   :  { %2844 = vmatpush3.bf16.msra.mxu0 %v2993_v30 }
 0x9c3   :  { %2845 = vmatprep.subr.bf16.mxu0 %v2994_v31 }
 0x9c6   :  { %2846 = vmatpush3.bf16.msra.mxu0 %v2994_v31 }
 0x9c7   :  { %2847 = vmatprep.subr.bf16.mxu0 %v2995_v52 }
 0x9ca   :  { %2848 = vmatpush3.bf16.msra.mxu0 %v2995_v52 }
 0x9cb   :  { %2849 = vmatprep.subr.bf16.mxu0 %v2996_v33 }
 0x9ce   :  { %2850 = vmatpush3.bf16.msra.mxu0 %v2996_v33 }
 0x9cf   :  { %2851 = vmatprep.subr.bf16.mxu0 %v2997_v37 }
 0x9d2   :  { %2852 = vmatpush3.bf16.msra.mxu0 %v2997_v37 }
 0x9d5   :  { %2854 = vmatmul.mubr.msk.bf16.vlgmr.msra.gmra.mrb[8].mxu0 %vm3168_vm5, %v2461_v21 }
 0xaa8   :  { %v3781_v39 = vpop.f32.mrb[8].mxu0 }
 0xaa9   :  { %v3783_v40 = vpop.f32.mrb[9].mxu0  ;;  %v2099_v29 = vmul.f32 %v3781_v39, %v3781_v39 }
 0xaaa   :  { %v3785_v42 = vpop.f32.mrb[10].mxu0  ;;  %v2097_v48 = vmul.f32 %v3783_v40, %v3783_v40 }
 0xaab   :  { %v3787_v46 = vpop.f32.mrb[11].mxu0  ;;  %v2100_v44 = vmul.f32 %v3785_v42, %v3785_v42 }
 0xaac   :  { %v2076_v45 = vadd.f32 %v3787_v46, %v3783_v40  ;;  %v2098_v49 = vmul.f32 %v3787_v46, %v3787_v46 }
 0xaae   :  { %v2077_v41 = vadd.f32 %v3781_v39, %v2076_v45  ;;  %v2101_v50 = vadd.f32 %v2098_v49, %v2097_v48 }
 0xab0   :  { %v2078_v51 = vadd.f32 %v3785_v42, %v2077_v41  ;;  %v2102_v61 = vadd.f32 %v2101_v50, %v2099_v29 }
 0xab2   :  { %v2079_v55 = vrot.slane %v2078_v51, 4  ;;  %v2103_v56 = vadd.f32 %v2102_v61, %v2100_v44 }
 0xab4   :  { %v2080_v57 = vadd.f32 %v2079_v55, %v2078_v51  ;;  %v2104_v59 = vrot.slane %v2103_v56, 4 }
 0xab6   :  { %v2081_v63 = vrot.slane %v2080_v57, 2  ;;  %v2105_v0 = vadd.f32 %v2104_v59, %v2103_v56 }
 0xab8   :  { %v2082_v1 = vadd.f32 %v2081_v63, %v2080_v57  ;;  %v2106_v2 = vrot.slane %v2105_v0, 2 }
 0xaba   :  { %v2083_v4 = vrot.slane %v2082_v1, 1  ;;  %v2107_v5 = vadd.f32 %v2106_v2, %v2105_v0 }
 0xabc   :  { %v2084_v10 = vadd.f32 %v2083_v4, %v2082_v1  ;;  %v2108_v11 = vrot.slane %v2107_v5, 1 }
 0xabe   :  { %2085 = vrot.lane.b32.xlu0 %v2084_v10, %s3009_s18  ;;  %v2109_v26 = vadd.f32 %v2108_v11, %v2107_v5 }
 0xac0   :  { %2110 = vrot.lane.b32.xlu1 %v2109_v26, %s3009_s18 }
 0xb30   :  { %v2086_v7 = vpop.permute.xlu0 %2085 }
 0xb31   :  { %v2087_v12 = vadd.f32 %v2086_v7, %v2084_v10 }
 0xb32   :  { %v2111_v9 = vpop.permute.xlu1 %2110 }
 0xb33   :  { %v2112_v36 = vadd.f32 %v2111_v9, %v2109_v26  ;;  %2088 = vrot.lane.b32.xlu0 %v2087_v12, %s3010_s19 }
 0xb35   :  { %2113 = vrot.lane.b32.xlu1 %v2112_v36, %s3010_s19 }
 0xba5   :  { %v2089_v35 = vpop.permute.xlu0 %2088 }
 0xba6   :  { %v2090_v34 = vadd.f32 %v2089_v35, %v2087_v12 }
 0xba7   :  { %v2114_v53 = vpop.permute.xlu1 %2113 }
 0xba8   :  { %v2115_v13 = vadd.f32 %v2114_v53, %v2112_v36  ;;  %2091 = vrot.lane.b32.xlu0 %v2090_v34, %s3011_s7 }
 0xbaa   :  { %2116 = vrot.lane.b32.xlu1 %v2115_v13, %s3011_s7 }
 0xc1a   :  { %v2092_v8 = vpop.permute.xlu0 %2091 }
 0xc1b   :  { %v2093_v14 = vadd.f32 %v2092_v8, %v2090_v34 }
 0xc1c   :  { %v2117_v58 = vpop.permute.xlu1 %2116 }
 0xc1d   :  { %v2118_v60 = vadd.f32 %v2117_v58, %v2115_v13  ;;  %2094 = vrot.lane.b32.xlu0 %v2093_v14, %s3012_s24 }
 0xc1f   :  { %2119 = vrot.lane.b32.xlu1 %v2118_v60, %s3012_s24 }
 0xc8f   :  { %v2095_v6 = vpop.permute.xlu0 %2094 }
 0xc90   :  { %v2096_v16 = vadd.f32 %v2095_v6, %v2093_v14 }
 0xc91   :  { %v2120_v17 = vpop.permute.xlu1 %2119 }
 0xc92   :  { %v2122_v18 = vmul.f32 0.001953125, %v2096_v16  ;;  %v2121_v19 = vadd.f32 %v2120_v17, %v2118_v60 }
 0xc94   :  { %v2124_v20 = vmul.f32 %v2122_v18, %v2122_v18  ;;  %v2123_v21 = vmul.f32 0.001953125, %v2121_v19 }
 0xc96   :  { %v2125_v15 = vsub.f32 %v2123_v21, %v2124_v20 }
 0xc98   :  { %v2126_v32 = vadd.f32 1e-05, %v2125_v15 }
 0xc9a   :  { %3006 = vrsqrt.f32 %v2126_v32 }
 0xca4   :  { %v3007_v22 = vpop.eup %3006 }
 0xca5   :  { %v2128_v23 = vmul.f32 %v3007_v22, %v2074_v3 }
 0xca7   :  { %v2133_v25 = vrot.slane %v2128_v23, %v3378_v47  ;;  %v2139_v27 = vmul.f32 %v2128_v23, %v2122_v18 }
 0xca9   :  { %v2140_v28 = vsub.f32 %v2075_v24, %v2139_v27  ;;  %v2135_v30 = vmul.f32 %v2133_v25, %v3783_v40  ;;  %v2136_v31 = vmul.f32 %v2133_v25, %v3787_v46  ;;  %v2137_v52 = vmul.f32 %v3781_v39, %v2133_v25 }
 0xcaa   :  { %v2138_v33 = vmul.f32 %v3785_v42, %v2133_v25 }
 0xcab   :  { %v2145_v37 = vrot.slane %v2140_v28, %v3378_v47 }
 0xcad   :  { %v2147_v48 = vadd.f32 %v2145_v37, %v2135_v30  ;;  %v2148_v45 = vadd.f32 %v2145_v37, %v2136_v31  ;;  %v2149_v49 = vadd.f32 %v2145_v37, %v2137_v52  ;;  %v2150_v29 = vadd.f32 %v2145_v37, %v2138_v33 }
 0xcaf   :  { %v2151_v41 = vadd.f32 %v2147_v48, %v3555_v54  ;;  %v2152_v50 = vadd.f32 %v2148_v45, %v3557_v43  ;;  %v2153_v44 = vadd.f32 %v2149_v49, %v3561_v62  ;;  %v2154_v40 = vadd.f32 %v2150_v29, %v3559_v38 }
 0xcb1   :  { %v2155_v51 = vmax.f32 %v2151_v41, 0.0  ;;  %v2156_v46 = vmax.f32 %v2152_v50, 0.0  ;;  %v2157_v61 = vmax.f32 %v2153_v44, 0.0  ;;  %v2158_v39 = vmax.f32 %v2154_v40, 0.0 }
 0xcb3   :  { %2159 = vst [vmem:[%s3853_s16] sm:$0xff] %v2155_v51  ;;  %2160 = vst [vmem:[%s3853_s16 + $0x8] sm:$0xff] %v2156_v46 }
 0xcb4   :  { %2161 = vst [vmem:[%s3853_s16 + $0x10] sm:$0xff] %v2157_v61  ;;  %2162 = vst [vmem:[%s3853_s16 + $0x18] sm:$0xff] %v2158_v39 }

</bundles_post_ra>
